<compile_context>
chip_gen: v7x
topology: tpu7x:2x2x1
jax: 0.10.0
libtpu: 0.0.40
codegen_flags: <defaults>
</compile_context>

<pallas_src>
import functools

import jax
import jax.numpy as jnp
from jax import lax
from jax.experimental import pallas as pl
from jax.experimental.pallas import tpu as pltpu

RELU_NF_SCALE = 1.7139588594436646
GATE_SCALE = 1.8


# ----------------------------------------------------------------------------
# Parameter glue (tiny per-filter reductions; done once in plain JAX / HBM)
# ----------------------------------------------------------------------------
def _ws_standardize(w_oihw, gain, eps=1e-4):
    """ScaledWSConv2d.get_weight(): scaled weight standardization."""
    fan_in = w_oihw.shape[1] * w_oihw.shape[2] * w_oihw.shape[3]
    mean = jnp.mean(w_oihw, axis=(1, 2, 3), keepdims=True)
    var = jnp.var(w_oihw, axis=(1, 2, 3), keepdims=True, ddof=1)  # unbiased
    scale = lax.rsqrt(jnp.maximum(var * fan_in, jnp.float32(eps))) * gain
    shift = mean * scale
    return w_oihw * scale - shift


def _fuse_gated_weights(w_sig, g_sig, w_gate, g_gate, mm_dtype):
    """Standardize, fuse signal||gate along O, and lay out as (9*C, 2*C) im2col."""
    ws = _ws_standardize(w_sig, g_sig)
    wg = _ws_standardize(w_gate, g_gate)
    w = jnp.concatenate([ws, wg], axis=0)          # (2C, C, 3, 3) OIHW
    w = jnp.transpose(w, (2, 3, 1, 0))             # (3, 3, C, 2C) HWIO
    kh, kw, ci, co = w.shape
    return w.reshape(kh * kw * ci, co).astype(mm_dtype)


# ----------------------------------------------------------------------------
# Kernel
# ----------------------------------------------------------------------------
def _resblock_kernel(xwin_ref, w1_ref, b1_ref, w2_ref, b2_ref, o_ref, ext_ref,
                     *, H, W, C, TH, CH, alpha, beta):
    # xwin_ref : (CH+2, W+2, C)  reflection-padded input rows for this tile
    # w*_ref   : (9*C, 2*C)      fused (signal||gate) im2col weights
    # b*_ref   : (1, 2*C)        fused biases
    # o_ref    : (TH, W, C)      output rows of this tile
    # ext_ref  : (CH+2, W+2, C)  scratch: reflection-padded conv1 output
    hb = pl.program_id(1)
    r0 = hb * TH                              # first output row of this tile
    b = jnp.clip(r0 - 1, 0, H - CH)           # first h1 row computed this tile
    start = r0 - b                            # row offset of virtual row r0-1 in ext

    def gated_conv(get_slab, rows, w_ref, b_ref):
        # Build the (rows*W, 9C) im2col patch matrix, one MXU matmul, gate.
        taps = []
        for ky in range(3):
            slab = get_slab(ky)               # (rows, W+2, C)
            for kx in range(3):
                taps.append(slab[:, kx:kx + W, :])
        p = jnp.concatenate(taps, axis=-1).reshape(rows * W, 9 * C)
        acc = jnp.dot(p.astype(w_ref.dtype), w_ref[...],
                      preferred_element_type=jnp.float32)
        z = acc + b_ref[...]
        sig = z[:, :C]
        gate = jax.nn.sigmoid(z[:, C:])
        return sig * gate * GATE_SCALE        # (rows*W, C), f32

    # ---- conv1: gated WS conv over relu_nf(x / beta) -----------------------
    h0 = jnp.maximum(xwin_ref[...] / beta, 0.0) * RELU_NF_SCALE
    g1 = gated_conv(lambda ky: h0[ky:ky + CH], CH, w1_ref, b1_ref)
    h2 = (jnp.maximum(g1, 0.0) * RELU_NF_SCALE).reshape(CH, W, C)   # relu_nf

    # ---- rebuild conv2's ReflectionPad2d(1) input window in scratch --------
    ext_ref[1:CH + 1, 1:W + 1, :] = h2
    ext_ref[1:CH + 1, 0:1, :] = h2[:, 1:2, :]                 # left reflect
    ext_ref[1:CH + 1, W + 1:W + 2, :] = h2[:, W - 2:W - 1, :]  # right reflect
    ext_ref[0:1, :, :] = ext_ref[2:3, :, :]                   # top reflect/halo
    ext_ref[CH + 1:CH + 2, :, :] = ext_ref[CH - 1:CH, :, :]   # bottom

    # ---- conv2: gated WS conv over the padded intermediate -----------------
    g2 = gated_conv(lambda ky: ext_ref[pl.ds(start + ky, TH)], TH,
                    w2_ref, b2_ref)

    # ---- residual -----------------------------------------------------------
    skip = xwin_ref[pl.ds(start + 1, TH), 1:W + 1, :]          # original x rows
    o_ref[...] = g2.reshape(TH, W, C) * alpha + skip


# ----------------------------------------------------------------------------
# Wrapper
# ----------------------------------------------------------------------------
def _choose_row_block(H, W, C, budget_bytes=4 << 20):
    """Largest divisor of H whose per-tile f32 working set fits the budget."""
    best = None
    for th in range(1, H + 1):
        if H % th:
            continue
        ch = min(th + 2, H)
        foot = 4 * (2 * (ch + 2) * (W + 2) * C      # input window + scratch
                    + ch * W * 9 * C                # im2col patches
                    + (ch + th) * W * 2 * C         # fused accumulators
                    + th * W * C)                   # output tile
        if foot <= budget_bytes or best is None:
            best = th
    return best


def resblock_forward(x_nchw, params, alpha=0.2, beta=1.0,
                     row_block=None, mm_dtype=jnp.float32):
    """ResBlock forward. x_nchw: (N, C, H, W) float32 -> (N, C, H, W)."""
    N, C, H, W = x_nchw.shape
    assert H >= 2 and W >= 2, "ReflectionPad2d(1) needs H, W >= 2"
    x = jnp.transpose(x_nchw, (0, 2, 3, 1)).astype(jnp.float32)   # NHWC

    TH = row_block if row_block is not None else _choose_row_block(H, W, C)
    assert H % TH == 0
    nHB = H // TH
    CH = min(TH + 2, H)      # conv1 rows computed per tile (1-row halo each side)
    WIN = CH + 2             # padded input rows needed per tile

    # Reflection-pad once in HBM, then gather the per-tile halo windows so the
    # Blocked pipeline never needs overlapping blocks.
    xp = jnp.pad(x, ((0, 0), (1, 1), (1, 1), (0, 0)), mode="reflect")
    starts = [min(max(hb * TH - 1, 0), H - CH) for hb in range(nHB)]
    windows = jnp.stack(
        [lax.slice_in_dim(xp, s, s + WIN, axis=1) for s in starts], axis=1)
    # windows: (N, nHB, WIN, W+2, C)

    w1 = _fuse_gated_weights(params["c1_conv_w"], params["c1_conv_gain"],
                             params["c1_gate_w"], params["c1_gate_gain"], mm_dtype)
    w2 = _fuse_gated_weights(params["c2_conv_w"], params["c2_conv_gain"],
                             params["c2_gate_w"], params["c2_gate_gain"], mm_dtype)
    b1 = jnp.concatenate([params["c1_conv_b"], params["c1_gate_b"]]
                         ).reshape(1, 2 * C).astype(jnp.float32)
    b2 = jnp.concatenate([params["c2_conv_b"], params["c2_gate_b"]]
                         ).reshape(1, 2 * C).astype(jnp.float32)

    kernel = functools.partial(_resblock_kernel, H=H, W=W, C=C, TH=TH, CH=CH,
                               alpha=float(alpha), beta=float(beta))

    # Explicit VMEM budget sized from the tiles (with headroom), capped so it
    # also fits v7x's smaller physical VMEM.
    tile_bytes = 4 * (2 * WIN * (W + 2) * C + CH * W * 9 * C
                      + (CH + TH) * W * 2 * C + TH * W * C)
    vmem_limit = int(min(max(6 * tile_bytes, 32 << 20), 48 << 20))

    grid_spec = pltpu.PrefetchScalarGridSpec(
        num_scalar_prefetch=0,
        grid=(N, nHB),
        in_specs=[
            pl.BlockSpec((None, None, WIN, W + 2, C),
                         lambda n, hb: (n, hb, 0, 0, 0)),
            pl.BlockSpec((9 * C, 2 * C), lambda n, hb: (0, 0)),
            pl.BlockSpec((1, 2 * C), lambda n, hb: (0, 0)),
            pl.BlockSpec((9 * C, 2 * C), lambda n, hb: (0, 0)),
            pl.BlockSpec((1, 2 * C), lambda n, hb: (0, 0)),
        ],
        out_specs=pl.BlockSpec((None, TH, W, C), lambda n, hb: (n, hb, 0, 0)),
        scratch_shapes=[pltpu.VMEM((WIN, W + 2, C), jnp.float32)],
    )

    out_nhwc = pl.pallas_call(
        kernel,
        out_shape=jax.ShapeDtypeStruct((N, H, W, C), jnp.float32),
        grid_spec=grid_spec,
        compiler_params=pltpu.CompilerParams(
            dimension_semantics=("parallel", "parallel"),
            vmem_limit_bytes=vmem_limit),
    )(windows, w1, b1, w2, b2)

    return jnp.transpose(out_nhwc, (0, 3, 1, 2))


# ----------------------------------------------------------------------------
# Pure-JAX reference (NCHW) for validation
# ----------------------------------------------------------------------------
def resblock_reference(x, params, alpha=0.2, beta=1.0):
    def conv(xp, w, b):
        y = lax.conv_general_dilated(
            xp, w, window_strides=(1, 1), padding="VALID",
            dimension_numbers=("NCHW", "OIHW", "NCHW"))
        return y + b[None, :, None, None]

    def gated(h, wc, bc, gc, wg, bg, gg):
        hp = jnp.pad(h, ((0, 0), (0, 0), (1, 1), (1, 1)), mode="reflect")
        sig = conv(hp, _ws_standardize(wc, gc), bc)
        gate = jax.nn.sigmoid(conv(hp, _ws_standardize(wg, gg), bg))
        return sig * gate * GATE_SCALE

    relu_nf = lambda t: jnp.maximum(t, 0.0) * RELU_NF_SCALE
    skip = x
    h = gated(relu_nf(x / beta),
              params["c1_conv_w"], params["c1_conv_b"], params["c1_conv_gain"],
              params["c1_gate_w"], params["c1_gate_b"], params["c1_gate_gain"])
    h = gated(relu_nf(h),
              params["c2_conv_w"], params["c2_conv_b"], params["c2_conv_gain"],
              params["c2_gate_w"], params["c2_gate_b"], params["c2_gate_gain"])
    return h * alpha + skip


def init_params(key, ch):
    ks = jax.random.split(key, 8)
    p = {}
    for i, name in enumerate(["c1_conv", "c1_gate", "c2_conv", "c2_gate"]):
        p[f"{name}_w"] = 0.1 * jax.random.normal(
            ks[2 * i], (ch, ch, 3, 3), dtype=jnp.float32)
        p[f"{name}_b"] = 0.05 * jax.random.normal(
            ks[2 * i + 1], (ch,), dtype=jnp.float32)
        p[f"{name}_gain"] = jnp.ones((ch, 1, 1, 1), dtype=jnp.float32)
    return p


if __name__ == "__main__":
    N, C, H, W = 2, 4, 16, 16
    key = jax.random.PRNGKey(0)
    kx, kp = jax.random.split(key)
    x = jax.random.normal(kx, (N, C, H, W), dtype=jnp.float32)
    params = init_params(kp, C)

    # row_block=4 exercises first / interior / last halo tiles (grid (2, 4)).
    # mm_dtype=jnp.bfloat16 is available for v6e/v7x (loosen tolerance if used).
    out = resblock_forward(x, params, alpha=0.2, beta=1.0, row_block=4)
    out = jax.block_until_ready(out)

    ref = jax.block_until_ready(resblock_reference(x, params, alpha=0.2, beta=1.0))
    assert out.shape == (N, C, H, W)
    err = float(jnp.max(jnp.abs(out - ref)))
    assert jnp.allclose(out, ref, atol=1e-4, rtol=1e-4), err
    print("KERNEL_OK")
</pallas_src>

<mosaic_0001>
module attributes {stable_mosaic.version = 11 : i64} {
  func.func @_resblock_kernel(%arg0: i32, %arg1: i32, %arg2: memref<1x1x8x18x4xf32, #tpu.memory_space<vmem>>, %arg3: memref<36x8xf32, #tpu.memory_space<vmem>>, %arg4: memref<1x8xf32, #tpu.memory_space<vmem>>, %arg5: memref<36x8xf32, #tpu.memory_space<vmem>>, %arg6: memref<1x8xf32, #tpu.memory_space<vmem>>, %arg7: memref<1x4x16x4xf32, #tpu.memory_space<vmem>>, %arg8: memref<8x18x4xf32, #tpu.memory_space<vmem>>) attributes {dimension_semantics = [#tpu.dimension_semantics<parallel>, #tpu.dimension_semantics<parallel>], iteration_bounds = array<i64: 2, 4>, scalar_prefetch = 0 : i64, scratch_operands = 1 : i64, tpu.core_type = #tpu.core_type<tc>, window_params = [{transform_indices = @transform_0, window_bounds = array<i64: 1, 1, 8, 18, 4>}, {pipeline_mode = #tpu.pipeline_mode<synchronous>, transform_indices = @transform_1, window_bounds = array<i64: 36, 8>}, {pipeline_mode = #tpu.pipeline_mode<synchronous>, transform_indices = @transform_2, window_bounds = array<i64: 1, 8>}, {pipeline_mode = #tpu.pipeline_mode<synchronous>, transform_indices = @transform_3, window_bounds = array<i64: 36, 8>}, {pipeline_mode = #tpu.pipeline_mode<synchronous>, transform_indices = @transform_4, window_bounds = array<i64: 1, 8>}, {transform_indices = @transform_5, window_bounds = array<i64: 1, 4, 16, 4>}]} {
    %c4_i32 = arith.constant 4 : i32
    %0 = arith.muli %arg1, %c4_i32 : i32
    %c1_i32 = arith.constant 1 : i32
    %1 = arith.subi %0, %c1_i32 : i32
    %c0_i32 = arith.constant 0 : i32
    %c10_i32 = arith.constant 10 : i32
    %2 = arith.maxsi %c0_i32, %1 : i32
    %3 = arith.minsi %c10_i32, %2 : i32
    %4 = arith.subi %0, %3 : i32
    %c0 = arith.constant 0 : index
    %c0_0 = arith.constant 0 : index
    %c0_1 = arith.constant 0 : index
    %c0_2 = arith.constant 0 : index
    %c0_3 = arith.constant 0 : index
    %5 = vector.load %arg2[%c0, %c0_0, %c0_1, %c0_2, %c0_3] : memref<1x1x8x18x4xf32, #tpu.memory_space<vmem>>, vector<1x1x8x18x4xf32>
    %6 = vector.shape_cast %5 : vector<1x1x8x18x4xf32> to vector<8x18x4xf32>
    %cst = arith.constant 1.000000e+00 : f32
    %7 = vector.broadcast %cst : f32 to vector<8x18x4xf32>
    %8 = arith.divf %6, %7 : vector<8x18x4xf32>
    %cst_4 = arith.constant 0.000000e+00 : f32
    %9 = vector.broadcast %cst_4 : f32 to vector<8x18x4xf32>
    %10 = arith.maximumf %8, %9 : vector<8x18x4xf32>
    %cst_5 = arith.constant 1.71395886 : f32
    %11 = vector.broadcast %cst_5 : f32 to vector<8x18x4xf32>
    %12 = arith.mulf %10, %11 : vector<8x18x4xf32>
    %13 = vector.extract_strided_slice %12 {offsets = [0, 0, 0], sizes = [6, 18, 4], strides = [1, 1, 1]} : vector<8x18x4xf32> to vector<6x18x4xf32>
    %14 = vector.extract_strided_slice %13 {offsets = [0, 0, 0], sizes = [6, 16, 4], strides = [1, 1, 1]} : vector<6x18x4xf32> to vector<6x16x4xf32>
    %15 = vector.extract_strided_slice %13 {offsets = [0, 1, 0], sizes = [6, 16, 4], strides = [1, 1, 1]} : vector<6x18x4xf32> to vector<6x16x4xf32>
    %16 = vector.extract_strided_slice %13 {offsets = [0, 2, 0], sizes = [6, 16, 4], strides = [1, 1, 1]} : vector<6x18x4xf32> to vector<6x16x4xf32>
    %17 = vector.extract_strided_slice %12 {offsets = [1, 0, 0], sizes = [6, 18, 4], strides = [1, 1, 1]} : vector<8x18x4xf32> to vector<6x18x4xf32>
    %18 = vector.extract_strided_slice %17 {offsets = [0, 0, 0], sizes = [6, 16, 4], strides = [1, 1, 1]} : vector<6x18x4xf32> to vector<6x16x4xf32>
    %19 = vector.extract_strided_slice %17 {offsets = [0, 1, 0], sizes = [6, 16, 4], strides = [1, 1, 1]} : vector<6x18x4xf32> to vector<6x16x4xf32>
    %20 = vector.extract_strided_slice %17 {offsets = [0, 2, 0], sizes = [6, 16, 4], strides = [1, 1, 1]} : vector<6x18x4xf32> to vector<6x16x4xf32>
    %21 = vector.extract_strided_slice %12 {offsets = [2, 0, 0], sizes = [6, 18, 4], strides = [1, 1, 1]} : vector<8x18x4xf32> to vector<6x18x4xf32>
    %22 = vector.extract_strided_slice %21 {offsets = [0, 0, 0], sizes = [6, 16, 4], strides = [1, 1, 1]} : vector<6x18x4xf32> to vector<6x16x4xf32>
    %23 = vector.extract_strided_slice %21 {offsets = [0, 1, 0], sizes = [6, 16, 4], strides = [1, 1, 1]} : vector<6x18x4xf32> to vector<6x16x4xf32>
    %24 = vector.extract_strided_slice %21 {offsets = [0, 2, 0], sizes = [6, 16, 4], strides = [1, 1, 1]} : vector<6x18x4xf32> to vector<6x16x4xf32>
    %25 = tpu.concatenate %14, %15, %16, %18, %19, %20, %22, %23, %24 in 2 : vector<6x16x4xf32>, vector<6x16x4xf32>, vector<6x16x4xf32>, vector<6x16x4xf32>, vector<6x16x4xf32>, vector<6x16x4xf32>, vector<6x16x4xf32>, vector<6x16x4xf32>, vector<6x16x4xf32> -> vector<6x16x36xf32>
    %26 = vector.shape_cast %25 : vector<6x16x36xf32> to vector<96x36xf32>
    %c0_6 = arith.constant 0 : index
    %c0_7 = arith.constant 0 : index
    %27 = vector.load %arg3[%c0_6, %c0_7] : memref<36x8xf32, #tpu.memory_space<vmem>>, vector<36x8xf32>
    %cst_8 = arith.constant dense<0.000000e+00> : vector<96x8xf32>
    %28 = tpu.matmul %26, %27, %cst_8 {dimension_numbers = #tpu.dot_dimension_numbers<[1], [0], [0], [1], [0, 0, 1, 1], [], []>} : vector<96x36xf32>, vector<36x8xf32>, vector<96x8xf32> -> vector<96x8xf32>
    %c0_9 = arith.constant 0 : index
    %c0_10 = arith.constant 0 : index
    %29 = vector.load %arg4[%c0_9, %c0_10] : memref<1x8xf32, #tpu.memory_space<vmem>>, vector<1x8xf32>
    %30 = vector.broadcast %29 : vector<1x8xf32> to vector<96x8xf32>
    %31 = arith.addf %28, %30 : vector<96x8xf32>
    %32 = vector.extract_strided_slice %31 {offsets = [0, 0], sizes = [96, 4], strides = [1, 1]} : vector<96x8xf32> to vector<96x4xf32>
    %33 = vector.extract_strided_slice %31 {offsets = [0, 4], sizes = [96, 4], strides = [1, 1]} : vector<96x8xf32> to vector<96x4xf32>
    %34 = arith.negf %33 : vector<96x4xf32>
    %35 = math.exp %34 : vector<96x4xf32>
    %cst_11 = arith.constant 1.000000e+00 : f32
    %36 = vector.broadcast %cst_11 : f32 to vector<96x4xf32>
    %37 = arith.addf %36, %35 : vector<96x4xf32>
    %38 = arith.divf %36, %37 : vector<96x4xf32>
    %39 = arith.mulf %32, %38 : vector<96x4xf32>
    %cst_12 = arith.constant 1.800000e+00 : f32
    %40 = vector.broadcast %cst_12 : f32 to vector<96x4xf32>
    %41 = arith.mulf %39, %40 : vector<96x4xf32>
    %cst_13 = arith.constant 0.000000e+00 : f32
    %42 = vector.broadcast %cst_13 : f32 to vector<96x4xf32>
    %43 = arith.maximumf %41, %42 : vector<96x4xf32>
    %cst_14 = arith.constant 1.71395886 : f32
    %44 = vector.broadcast %cst_14 : f32 to vector<96x4xf32>
    %45 = arith.mulf %43, %44 : vector<96x4xf32>
    %46 = vector.shape_cast %45 : vector<96x4xf32> to vector<6x16x4xf32>
    %c1 = arith.constant 1 : index
    %c1_15 = arith.constant 1 : index
    %c0_16 = arith.constant 0 : index
    %47 = vector.load %arg8[%c1, %c1_15, %c0_16] : memref<8x18x4xf32, #tpu.memory_space<vmem>>, vector<6x16x4xf32>
    tpu.vector_store %arg8[%c1, %c1_15, %c0_16], %46 {strides = array<i32>} : memref<8x18x4xf32, #tpu.memory_space<vmem>>, vector<6x16x4xf32>,
    %48 = vector.extract_strided_slice %46 {offsets = [0, 1, 0], sizes = [6, 1, 4], strides = [1, 1, 1]} : vector<6x16x4xf32> to vector<6x1x4xf32>
    %c1_17 = arith.constant 1 : index
    %c0_18 = arith.constant 0 : index
    %c0_19 = arith.constant 0 : index
    %49 = vector.load %arg8[%c1_17, %c0_18, %c0_19] : memref<8x18x4xf32, #tpu.memory_space<vmem>>, vector<6x1x4xf32>
    tpu.vector_store %arg8[%c1_17, %c0_18, %c0_19], %48 {strides = array<i32>} : memref<8x18x4xf32, #tpu.memory_space<vmem>>, vector<6x1x4xf32>,
    %50 = vector.extract_strided_slice %46 {offsets = [0, 14, 0], sizes = [6, 1, 4], strides = [1, 1, 1]} : vector<6x16x4xf32> to vector<6x1x4xf32>
    %c1_20 = arith.constant 1 : index
    %c17 = arith.constant 17 : index
    %c0_21 = arith.constant 0 : index
    %51 = vector.load %arg8[%c1_20, %c17, %c0_21] : memref<8x18x4xf32, #tpu.memory_space<vmem>>, vector<6x1x4xf32>
    tpu.vector_store %arg8[%c1_20, %c17, %c0_21], %50 {strides = array<i32>} : memref<8x18x4xf32, #tpu.memory_space<vmem>>, vector<6x1x4xf32>,
    %c2 = arith.constant 2 : index
    %c0_22 = arith.constant 0 : index
    %c0_23 = arith.constant 0 : index
    %52 = vector.load %arg8[%c2, %c0_22, %c0_23] : memref<8x18x4xf32, #tpu.memory_space<vmem>>, vector<1x18x4xf32>
    %c0_24 = arith.constant 0 : index
    %c0_25 = arith.constant 0 : index
    %c0_26 = arith.constant 0 : index
    %53 = vector.load %arg8[%c0_24, %c0_25, %c0_26] : memref<8x18x4xf32, #tpu.memory_space<vmem>>, vector<1x18x4xf32>
    tpu.vector_store %arg8[%c0_24, %c0_25, %c0_26], %52 {strides = array<i32>} : memref<8x18x4xf32, #tpu.memory_space<vmem>>, vector<1x18x4xf32>,
    %c5 = arith.constant 5 : index
    %c0_27 = arith.constant 0 : index
    %c0_28 = arith.constant 0 : index
    %54 = vector.load %arg8[%c5, %c0_27, %c0_28] : memref<8x18x4xf32, #tpu.memory_space<vmem>>, vector<1x18x4xf32>
    %c7 = arith.constant 7 : index
    %c0_29 = arith.constant 0 : index
    %c0_30 = arith.constant 0 : index
    %55 = vector.load %arg8[%c7, %c0_29, %c0_30] : memref<8x18x4xf32, #tpu.memory_space<vmem>>, vector<1x18x4xf32>
    tpu.vector_store %arg8[%c7, %c0_29, %c0_30], %54 {strides = array<i32>} : memref<8x18x4xf32, #tpu.memory_space<vmem>>, vector<1x18x4xf32>,
    %c0_i32_31 = arith.constant 0 : i32
    %56 = arith.addi %4, %c0_i32_31 : i32
    %57 = arith.index_cast %56 : i32 to index
    %c0_32 = arith.constant 0 : index
    %c0_33 = arith.constant 0 : index
    %58 = vector.load %arg8[%57, %c0_32, %c0_33] : memref<8x18x4xf32, #tpu.memory_space<vmem>>, vector<4x18x4xf32>
    %59 = vector.extract_strided_slice %58 {offsets = [0, 0, 0], sizes = [4, 16, 4], strides = [1, 1, 1]} : vector<4x18x4xf32> to vector<4x16x4xf32>
    %60 = vector.extract_strided_slice %58 {offsets = [0, 1, 0], sizes = [4, 16, 4], strides = [1, 1, 1]} : vector<4x18x4xf32> to vector<4x16x4xf32>
    %61 = vector.extract_strided_slice %58 {offsets = [0, 2, 0], sizes = [4, 16, 4], strides = [1, 1, 1]} : vector<4x18x4xf32> to vector<4x16x4xf32>
    %c1_i32_34 = arith.constant 1 : i32
    %62 = arith.addi %4, %c1_i32_34 : i32
    %63 = arith.index_cast %62 : i32 to index
    %c0_35 = arith.constant 0 : index
    %c0_36 = arith.constant 0 : index
    %64 = vector.load %arg8[%63, %c0_35, %c0_36] : memref<8x18x4xf32, #tpu.memory_space<vmem>>, vector<4x18x4xf32>
    %65 = vector.extract_strided_slice %64 {offsets = [0, 0, 0], sizes = [4, 16, 4], strides = [1, 1, 1]} : vector<4x18x4xf32> to vector<4x16x4xf32>
    %66 = vector.extract_strided_slice %64 {offsets = [0, 1, 0], sizes = [4, 16, 4], strides = [1, 1, 1]} : vector<4x18x4xf32> to vector<4x16x4xf32>
    %67 = vector.extract_strided_slice %64 {offsets = [0, 2, 0], sizes = [4, 16, 4], strides = [1, 1, 1]} : vector<4x18x4xf32> to vector<4x16x4xf32>
    %c2_i32 = arith.constant 2 : i32
    %68 = arith.addi %4, %c2_i32 : i32
    %69 = arith.index_cast %68 : i32 to index
    %c0_37 = arith.constant 0 : index
    %c0_38 = arith.constant 0 : index
    %70 = vector.load %arg8[%69, %c0_37, %c0_38] : memref<8x18x4xf32, #tpu.memory_space<vmem>>, vector<4x18x4xf32>
    %71 = vector.extract_strided_slice %70 {offsets = [0, 0, 0], sizes = [4, 16, 4], strides = [1, 1, 1]} : vector<4x18x4xf32> to vector<4x16x4xf32>
    %72 = vector.extract_strided_slice %70 {offsets = [0, 1, 0], sizes = [4, 16, 4], strides = [1, 1, 1]} : vector<4x18x4xf32> to vector<4x16x4xf32>
    %73 = vector.extract_strided_slice %70 {offsets = [0, 2, 0], sizes = [4, 16, 4], strides = [1, 1, 1]} : vector<4x18x4xf32> to vector<4x16x4xf32>
    %74 = tpu.concatenate %59, %60, %61, %65, %66, %67, %71, %72, %73 in 2 : vector<4x16x4xf32>, vector<4x16x4xf32>, vector<4x16x4xf32>, vector<4x16x4xf32>, vector<4x16x4xf32>, vector<4x16x4xf32>, vector<4x16x4xf32>, vector<4x16x4xf32>, vector<4x16x4xf32> -> vector<4x16x36xf32>
    %75 = vector.shape_cast %74 : vector<4x16x36xf32> to vector<64x36xf32>
    %c0_39 = arith.constant 0 : index
    %c0_40 = arith.constant 0 : index
    %76 = vector.load %arg5[%c0_39, %c0_40] : memref<36x8xf32, #tpu.memory_space<vmem>>, vector<36x8xf32>
    %cst_41 = arith.constant dense<0.000000e+00> : vector<64x8xf32>
    %77 = tpu.matmul %75, %76, %cst_41 {dimension_numbers = #tpu.dot_dimension_numbers<[1], [0], [0], [1], [0, 0, 1, 1], [], []>} : vector<64x36xf32>, vector<36x8xf32>, vector<64x8xf32> -> vector<64x8xf32>
    %c0_42 = arith.constant 0 : index
    %c0_43 = arith.constant 0 : index
    %78 = vector.load %arg6[%c0_42, %c0_43] : memref<1x8xf32, #tpu.memory_space<vmem>>, vector<1x8xf32>
    %79 = vector.broadcast %78 : vector<1x8xf32> to vector<64x8xf32>
    %80 = arith.addf %77, %79 : vector<64x8xf32>
    %81 = vector.extract_strided_slice %80 {offsets = [0, 0], sizes = [64, 4], strides = [1, 1]} : vector<64x8xf32> to vector<64x4xf32>
    %82 = vector.extract_strided_slice %80 {offsets = [0, 4], sizes = [64, 4], strides = [1, 1]} : vector<64x8xf32> to vector<64x4xf32>
    %83 = arith.negf %82 : vector<64x4xf32>
    %84 = math.exp %83 : vector<64x4xf32>
    %cst_44 = arith.constant 1.000000e+00 : f32
    %85 = vector.broadcast %cst_44 : f32 to vector<64x4xf32>
    %86 = arith.addf %85, %84 : vector<64x4xf32>
    %87 = arith.divf %85, %86 : vector<64x4xf32>
    %88 = arith.mulf %81, %87 : vector<64x4xf32>
    %cst_45 = arith.constant 1.800000e+00 : f32
    %89 = vector.broadcast %cst_45 : f32 to vector<64x4xf32>
    %90 = arith.mulf %88, %89 : vector<64x4xf32>
    %c1_i32_46 = arith.constant 1 : i32
    %91 = arith.addi %4, %c1_i32_46 : i32
    %c0_47 = arith.constant 0 : index
    %c0_48 = arith.constant 0 : index
    %92 = arith.index_cast %91 : i32 to index
    %c1_49 = arith.constant 1 : index
    %c0_50 = arith.constant 0 : index
    %93 = vector.load %arg2[%c0_47, %c0_48, %92, %c1_49, %c0_50] : memref<1x1x8x18x4xf32, #tpu.memory_space<vmem>>, vector<1x1x4x16x4xf32>
    %94 = vector.shape_cast %93 : vector<1x1x4x16x4xf32> to vector<4x16x4xf32>
    %95 = vector.shape_cast %90 : vector<64x4xf32> to vector<4x16x4xf32>
    %cst_51 = arith.constant 2.000000e-01 : f32
    %96 = vector.broadcast %cst_51 : f32 to vector<4x16x4xf32>
    %97 = arith.mulf %95, %96 : vector<4x16x4xf32>
    %98 = arith.addf %97, %94 : vector<4x16x4xf32>
    %c0_52 = arith.constant 0 : index
    %c0_53 = arith.constant 0 : index
    %c0_54 = arith.constant 0 : index
    %c0_55 = arith.constant 0 : index
    %99 = vector.load %arg7[%c0_52, %c0_53, %c0_54, %c0_55] : memref<1x4x16x4xf32, #tpu.memory_space<vmem>>, vector<1x4x16x4xf32>
    %100 = vector.shape_cast %99 : vector<1x4x16x4xf32> to vector<4x16x4xf32>
    %101 = vector.shape_cast %98 : vector<4x16x4xf32> to vector<1x4x16x4xf32>
    tpu.vector_store %arg7[%c0_52, %c0_53, %c0_54, %c0_55], %101 {strides = array<i32>} : memref<1x4x16x4xf32, #tpu.memory_space<vmem>>, vector<1x4x16x4xf32>,
    return
  }
  func.func @transform_0(%arg0: i32, %arg1: i32) -> (i32, i32, i32, i32, i32) {
    %c0_i32 = arith.constant 0 : i32
    %c0_i32_0 = arith.constant 0 : i32
    %c0_i32_1 = arith.constant 0 : i32
    %c0_i32_2 = arith.constant 0 : i32
    return %arg0, %arg1, %c0_i32, %c0_i32_0, %c0_i32_1 : i32, i32, i32, i32, i32
  }
  func.func @transform_1(%arg0: i32, %arg1: i32) -> (i32, i32) {
    %c0_i32 = arith.constant 0 : i32
    %c0_i32_0 = arith.constant 0 : i32
    %c0_i32_1 = arith.constant 0 : i32
    return %c0_i32, %c0_i32_0 : i32, i32
  }
  func.func @transform_2(%arg0: i32, %arg1: i32) -> (i32, i32) {
    %c0_i32 = arith.constant 0 : i32
    %c0_i32_0 = arith.constant 0 : i32
    %c0_i32_1 = arith.constant 0 : i32
    return %c0_i32, %c0_i32_0 : i32, i32
  }
  func.func @transform_3(%arg0: i32, %arg1: i32) -> (i32, i32) {
    %c0_i32 = arith.constant 0 : i32
    %c0_i32_0 = arith.constant 0 : i32
    %c0_i32_1 = arith.constant 0 : i32
    return %c0_i32, %c0_i32_0 : i32, i32
  }
  func.func @transform_4(%arg0: i32, %arg1: i32) -> (i32, i32) {
    %c0_i32 = arith.constant 0 : i32
    %c0_i32_0 = arith.constant 0 : i32
    %c0_i32_1 = arith.constant 0 : i32
    return %c0_i32, %c0_i32_0 : i32, i32
  }
  func.func @transform_5(%arg0: i32, %arg1: i32) -> (i32, i32, i32, i32) {
    %c0_i32 = arith.constant 0 : i32
    %c0_i32_0 = arith.constant 0 : i32
    %c0_i32_1 = arith.constant 0 : i32
    return %arg0, %arg1, %c0_i32, %c0_i32_0 : i32, i32, i32, i32
  }
}

</mosaic_0001>

<bundles_post_ra>
// kernel: tpu_custom_call.1
= control target key start
LH: loop header
LB: loop body
LE: loop exit
PB: predicated region body
PF: predicated region fallthrough
CT: control target
= control target key end

     0   :  { %s2472_s18 = smov 0   ;;  %s2474_s19 = smov 0   ;;  %s3480_s0 = inlined_call_operand.vmem [shape: f32[2,4,8,18,4], index: 0, kind: input, shape index: {}]   ;;  %s3481_s1 = inlined_call_operand.vmem [shape: f32[36,8], index: 1, kind: input, shape index: {}]   ;;  %s3482_s2 = inlined_call_operand.vmem [shape: f32[1,8], index: 2, kind: input, shape index: {}]   ;;  %s3483_s3 = inlined_call_operand.vmem [shape: f32[36,8], index: 3, kind: input, shape index: {}]   ;;  %s3484_s4 = inlined_call_operand.vmem [shape: f32[1,8], index: 4, kind: input, shape index: {}]   ;;  %s3485_s5 = inlined_call_operand.vmem [shape: f32[2,16,16,4], index: 5, kind: output, shape index: {}]  }
   0x1   :  { %s2476_s20 = smov 0   ;;  %s2478_s21 = smov 0  }
   0x2   :  { %s2480_s22 = smov 0  }
   0x3 LB: > { %s24_s23 = sadd.s32 1, %s2423_s20  ;;  %s27_s24 = sadd.s32 1, %s2427_s21  ;;  %s2431_s22 = sphi %s2480_s22, %s15_s22   ;;  %s2427_s21 = sphi %s2478_s21, %s3489_s21   ;;  %s2423_s20 = sphi %s2476_s20, %s3488_s20   ;;  %s2419_s19 = sphi %s2474_s19, %s3487_s19   ;;  %s2415_s18 = sphi %s2472_s18, %s3486_s18  }
   0x4   : > { %p25_p0 = scmp.ge.s32.totalorder %s24_s23, 4  ;;  %p2073_p1 = scmp.ge.s32.totalorder %s2431_s22, 1 }
   0x5   : > { %p207_p2 = scmp.lt.s32.totalorder %s2431_s22, 9 }
   0x6   : > { %s3491_s23 = smov (%p25_p0, %s24_s23), 0  ;;  %s3493_s24 = smov (!%p25_p0, %s27_s24), %s2427_s21 }
   0x7   : > { %p208_p3 = pnand %p2073_p1, %p207_p2  ;;  %p29_p4 = scmp.ge.s32.totalorder %s3493_s24, 2 }
   0x8   : > { %p244_p5 = scmp.lt.s32.totalorder (!%p208_p3), %s2419_s19, 1  ;;  %p246_p6 = scmp.lt.s32.totalorder (!%p208_p3), %s2415_s18, 3  ;;  %vm428_vm0 = vcmask (!%p208_p3), 1045504   ;;  %vm361_vm1 = vcmask (!%p208_p3), 1046528   ;;  %v841_v45 = vld [vmem:[%s3481_s1] sm:$0xff] (!%p208_p3)  ;;  %v842_v46 = vld [vmem:[%s3481_s1 + $0x8] sm:$0xff] (!%p208_p3) }
   0x9   : > { %s3495_s24 = smov (%p29_p4, %s3493_s24), 0  ;;  %211 = sbr.rel (%p208_p3) target bundleno = 1314 (0x522), region = 40 }
   0xa   : > { %s2433_s8 = smov (!%p208_p3), 12   ;;  %s2434_s9 = smov (!%p208_p3), 8   ;;  %v2246_v50 = vpack.c.bf16 (!%p208_p3), %v842_v46, %v841_v45  ;;  %v843_v51 = vld [vmem:[%s3481_s1 + $0x10] sm:$0xff] (!%p208_p3)  ;;  %v844_v52 = vld [vmem:[%s3481_s1 + $0x18] sm:$0xff] (!%p208_p3)  ;;  %v845_v56 = vld [vmem:[%s3481_s1 + $0x20] sm:$0xf] (!%p208_p3) }
   0xb   : > { %s2435_s10 = smov (!%p208_p3), 4   ;;  %s2436_s11 = smov (!%p208_p3), 16   ;;  %v2250_v55 = vpack.c.bf16 (!%p208_p3), %v844_v52, %v843_v51  ;;  %vm890_vm2 = vcmask (!%p208_p3), 1043456   ;;  %vm737_vm3 = vcmask (!%p208_p3), 31744   ;;  %vm750_vm4 = vcmask (!%p208_p3), 64512  }
   0xc   : > { %s2437_s12 = smov (!%p208_p3), 20   ;;  %s2438_s13 = smov (!%p208_p3), 24   ;;  %2247 = vmatprep.subr.bf16.mxu0 (!%p208_p3), %v2246_v50  ;;  %vm763_vm5 = vcmask (!%p208_p3), 97280   ;;  %vm776_vm6 = vcmask (!%p208_p3), 130048   ;;  %vm789_vm7 = vcmask (!%p208_p3), 162816   ;;  %vm802_vm8 = vcmask (!%p208_p3), 195584  }
   0xd   : > { %2249 = vmatpush3.bf16.msra.mxu0 (!%p208_p3), %v2246_v50  ;;  %s2440_s14 = smov (!%p208_p3), 32   ;;  %vm815_vm9 = vcmask (!%p208_p3), 228352   ;;  %vm828_vm10 = vcmask (!%p208_p3), 261120   ;;  %vm853_vm11 = vcmask (!%p208_p3), 293888   ;;  %s2441_s17 = smov (!%p208_p3), 124   ;;  %vm1207_vm12 = vcmask (!%p208_p3), 30726  }
   0xe   : > { %2251 = vmatprep.subr.bf16.mxu0 (!%p208_p3), %v2250_v55  ;;  %vm1200_vm13 = vcmask (!%p208_p3), 25601   ;;  %vm1220_vm14 = vcmask (!%p208_p3), 25600  }
  0x10   : > { %s3497_s19 = smov (!%p244_p5, %s2419_s19), 1 }
  0x11   : > { %s247_s25 = scalar_select %p246_p6, %s2415_s18, 3  ;;  %2253 = vmatpush3.bf16.msra.mxu0 %v2250_v55 }
  0x12   : > { %s2263_s26 = smul.u32 96, %s3497_s19  ;;  %2204 = vmatprep.subr.msk.mxu0 %vm890_vm2, %v845_v56 }
  0x13   : > { %s2262_s27 = smul.u32 24, %s247_s25  ;;  %s3046_s25 = sshll.u32 %s2415_s18, 2 }
  0x14   : > { %p256_p9 = scmp.lt.s32.totalorder %s3046_s25, 15 }
  0x15   : > { %s250_s28 = sadd.s32 %s2263_s26, %s2262_s27  ;;  %2205 = vmatpush3.msk.msra.mxu0 %vm890_vm2, %v845_v56  ;;  %s2080_s26 = sadd.s32 4294967295, %s3046_s25 }
  0x16   : > { %s2074_s29 = sshll.u32 %s250_s28, 3  ;;  %p266_p7 = scmp.gt.s32.totalorder %s2080_s26, 0 }
  0x17   : > { %s2512_s7 = scalar_lea.vmem %s3480_s0, %s2074_s29  ;;  %s2439_s29 = smov 28  }
  0x18   : > { %v275_v0 = vld [vmem:[%s2512_s7 + $0x20] sm:$0xff]  ;;  %v274_v1 = vld [vmem:[%s2512_s7 + $0x18] sm:$0xff]  ;;  %v272_v5 = vld [vmem:[%s2512_s7 + $0x8] sm:$0xff]  ;;  %s267_s27 = scalar_select %p266_p7, %s2080_s26, 0 }
  0x19   : > { %v271_v2 = vld [vmem:[%s2512_s7] sm:$0xff]  ;;  %v299_v3 = vmax.f32 %v275_v0, 0.0  ;;  %v298_v4 = vmax.f32 %v274_v1, 0.0  ;;  %v273_v7 = vld [vmem:[%s2512_s7 + $0x10] sm:$0x3]  ;;  %v296_v8 = vmax.f32 %v272_v5, 0.0 }
  0x1a   : > { %v295_v6 = vmax.f32 %v271_v2, 0.0  ;;  %v297_v9 = vmax.f32 %v273_v7, 0.0  ;;  %v276_v10 = vld [vmem:[%s2512_s7 + $0x28] sm:$0x3]  ;;  %v277_v36 = vld [vmem:[%s2512_s7 + $0x30] sm:$0xff]  ;;  %v278_v37 = vld [vmem:[%s2512_s7 + $0x38] sm:$0xff] }
  0x1b   : > { %v2520_v11 = vmul.f32 1.7139589, %v299_v3  ;;  %v2522_v12 = vmul.f32 1.7139589, %v298_v4  ;;  %v2526_v14 = vmul.f32 1.7139589, %v296_v8 }
  0x1c   : > { %v2524_v13 = vmul.f32 1.7139589, %v295_v6  ;;  %v321_v15 = vmul.f32 1.7139589, %v297_v9  ;;  %v300_v18 = vmax.f32 %v276_v10, 0.0  ;;  %v301_v38 = vmax.f32 %v277_v36, 0.0 }
  0x1d   : > { %499 = vrot.lane.b32.xlu1 %v2520_v11, %s2433_s8  ;;  %497 = vrot.lane.b32.xlu0 %v2522_v12, %s2433_s8  ;;  %v430_v19 = vrot.slane %v2526_v14, 2  ;;  %v363_v20 = vrot.slane %v2526_v14, 1  ;;  %v367_v25 = vrot.slane %v2522_v12, 1  ;;  %v368_v28 = vrot.slane %v2520_v11, 1  ;;  %v279_v44 = vld [vmem:[%s2512_s7 + $0x40] sm:$0x3] }
  0x1e   : > { %v429_v16 = vrot.slane %v2524_v13, 2  ;;  %v362_v17 = vrot.slane %v2524_v13, 1  ;;  %v432_v21 = vrot.slane %v321_v15, 2  ;;  %v365_v22 = vrot.slane %v321_v15, 1  ;;  %v280_v0 = vld [vmem:[%s2512_s7 + $0x48] sm:$0xff]  ;;  %v281_v1 = vld [vmem:[%s2512_s7 + $0x50] sm:$0xff] }
  0x1f   : > { %v324_v29 = vmul.f32 1.7139589, %v300_v18  ;;  %v369_v30 = vsel %vm361_vm1, %v367_v25, %v368_v28  ;;  %v434_v31 = vrot.slane %v2522_v12, 2  ;;  %v435_v32 = vrot.slane %v2520_v11, 2  ;;  %v282_v6 = vld [vmem:[%s2512_s7 + $0x58] sm:$0x3] }
  0x20   : > { %v431_v23 = vsel %vm428_vm0, %v429_v16, %v430_v19  ;;  %v364_v24 = vsel %vm361_vm1, %v362_v17, %v363_v20  ;;  %v433_v26 = vsel %vm428_vm0, %v430_v19, %v432_v21  ;;  %v366_v27 = vsel %vm361_vm1, %v363_v20, %v365_v22  ;;  %v287_v45 = vld [vmem:[%s2512_s7 + $0x80] sm:$0xff]  ;;  %p2081_p8 = scmp.lt.s32.totalorder %s2080_s26, 10 }
  0x21   : > { %459 = vrot.lane.b32.xlu1 %v431_v23, %s2434_s9  ;;  %392 = vrot.lane.b32.xlu0 %v364_v24, %s2435_s10  ;;  %v370_v33 = vrot.slane %v324_v29, 1  ;;  %v436_v34 = vsel %vm428_vm0, %v434_v31, %v435_v32  ;;  %v437_v39 = vrot.slane %v324_v29, 2  ;;  %v302_v40 = vmax.f32 %v278_v37, 0.0  ;;  %v283_v23 = vld [vmem:[%s2512_s7 + $0x60] sm:$0xff]  ;;  %v284_v24 = vld [vmem:[%s2512_s7 + $0x68] sm:$0xff] }
  0x22   : > { %v2559_v41 = vmul.f32 1.7139589, %v301_v38  ;;  %v303_v49 = vmax.f32 %v279_v44, 0.0  ;;  %v304_v2 = vmax.f32 %v280_v0, 0.0  ;;  %v305_v3 = vmax.f32 %v281_v1, 0.0  ;;  %v286_v44 = vld [vmem:[%s2512_s7 + $0x78] sm:$0xff] }
  0x23   : > { %v371_v35 = vsel %vm361_vm1, %v368_v28, %v370_v33  ;;  %v438_v42 = vsel %vm428_vm0, %v435_v32, %v437_v39  ;;  %v2562_v43 = vmul.f32 1.7139589, %v302_v40  ;;  %v306_v9 = vmax.f32 %v282_v6, 0.0  ;;  %v285_v29 = vld [vmem:[%s2512_s7 + $0x70] sm:$0x3]  ;;  %s3499_s27 = smov (!%p2081_p8, %s267_s27), 10 }
  0x24   : > { %v372_v47 = vrot.slane %v2559_v41, 1  ;;  %v327_v54 = vmul.f32 1.7139589, %v303_v49  ;;  %v439_v57 = vrot.slane %v2559_v41, 2  ;;  %v2612_v4 = vmul.f32 1.7139589, %v304_v2  ;;  %s270_s18 = ssub.s32 %s3046_s25, %s3499_s27 }
  0x25   : > { %461 = vrot.lane.b32.xlu1 %v433_v26, %s2434_s9  ;;  %394 = vrot.lane.b32.xlu0 %v366_v27, %s2435_s10  ;;  %v373_v48 = vrot.slane %v2562_v43, 1  ;;  %v440_v58 = vrot.slane %v2562_v43, 2  ;;  %v2614_v5 = vmul.f32 1.7139589, %v305_v3  ;;  %v330_v15 = vmul.f32 1.7139589, %v306_v9 }
  0x26   : > { %v375_v59 = vrot.slane %v327_v54, 1  ;;  %v442_v62 = vrot.slane %v327_v54, 2  ;;  %v377_v7 = vrot.slane %v2612_v4, 1  ;;  %v444_v16 = vrot.slane %v2612_v4, 2  ;;  %v288_v54 = vld [vmem:[%s2512_s7 + $0x88] sm:$0x3] }
  0x27   : > { %v374_v53 = vsel %vm361_vm1, %v372_v47, %v373_v48  ;;  %v441_v60 = vsel %vm428_vm0, %v439_v57, %v440_v58  ;;  %v378_v8 = vrot.slane %v2614_v5, 1  ;;  %v445_v17 = vrot.slane %v2614_v5, 2  ;;  %s3059_s28 = smul.u32 24, %s270_s18  ;;  %s3501_s25 = smov (!%p256_p9, %s3046_s25), 15 }
  0x28   : > { %v376_v61 = vsel %vm361_vm1, %v373_v48, %v375_v59  ;;  %v443_v63 = vsel %vm428_vm0, %v440_v58, %v442_v62  ;;  %v380_v18 = vrot.slane %v330_v15, 1  ;;  %v447_v21 = vrot.slane %v330_v15, 2  ;;  %v290_v15 = vld [vmem:[%s2512_s7 + $0x98] sm:$0xff] }
  0x29   : > { %396 = vrot.lane.b32.xlu1 %v369_v30, %s2435_s10  ;;  %539 = vrot.lane.b32.xlu0 %v369_v30, %s2436_s11  ;;  %v379_v10 = vsel %vm361_vm1, %v377_v7, %v378_v8  ;;  %v446_v19 = vsel %vm428_vm0, %v444_v16, %v445_v17  ;;  %v307_v25 = vmax.f32 %v283_v23, 0.0  ;;  %v308_v26 = vmax.f32 %v284_v24, 0.0  ;;  %v289_v16 = vld [vmem:[%s2512_s7 + $0x90] sm:$0xff]  ;;  %s3062_s30 = scalar_lea.vmem [#allocation2], %s3059_s28 }
  0x2a   : > { %v381_v20 = vsel %vm361_vm1, %v378_v8, %v380_v18  ;;  %v448_v22 = vsel %vm428_vm0, %v445_v17, %v447_v21  ;;  %v309_v32 = vmax.f32 %v285_v29, 0.0  ;;  %v310_v46 = vmax.f32 %v286_v44, 0.0  ;;  %v291_v17 = vld [vmem:[%s2512_s7 + $0xa0] sm:$0x3] }
  0x2b   : > { %v2647_v27 = vmul.f32 1.7139589, %v307_v25  ;;  %v2649_v28 = vmul.f32 1.7139589, %v308_v26  ;;  %v311_v47 = vmax.f32 %v287_v45, 0.0  ;;  %v312_v57 = vmax.f32 %v288_v54, 0.0 }
  0x2c   : > { %v2686_v50 = vmul.f32 1.7139589, %v310_v46  ;;  %v315_v21 = vmax.f32 %v291_v17, 0.0 }
  0x2d   : > { %580 = vrot.lane.b32.xlu1 %v436_v34, %s2437_s12  ;;  %541 = vrot.lane.b32.xlu0 %v371_v35, %s2436_s11  ;;  %v382_v30 = vrot.slane %v2647_v27, 1  ;;  %v383_v31 = vrot.slane %v2649_v28, 1  ;;  %v450_v36 = vrot.slane %v2649_v28, 2  ;;  %v2688_v51 = vmul.f32 1.7139589, %v311_v47 }
  0x2e   : > { %v387_v55 = vrot.slane %v2686_v50, 1  ;;  %v454_v0 = vrot.slane %v2686_v50, 2  ;;  %v339_v29 = vmul.f32 1.7139589, %v315_v21 }
  0x2f   : > { %v384_v33 = vsel %vm361_vm1, %v382_v30, %v383_v31  ;;  %v388_v56 = vrot.slane %v2688_v51, 1  ;;  %v455_v1 = vrot.slane %v2688_v51, 2 }
  0x31   : > { %463 = vrot.lane.b32.xlu1 %v436_v34, %s2434_s9  ;;  %398 = vrot.lane.b32.xlu0 %v371_v35, %s2435_s10  ;;  %v333_v34 = vmul.f32 1.7139589, %v309_v32  ;;  %v449_v35 = vrot.slane %v2647_v27, 2  ;;  %v2721_v7 = vsel %vm428_vm0, %v454_v0, %v455_v1 }
  0x33   : > { %v385_v37 = vrot.slane %v333_v34, 1  ;;  %v451_v38 = vsel %vm428_vm0, %v449_v35, %v450_v36  ;;  %v452_v40 = vrot.slane %v333_v34, 2  ;;  %v537_v34 = vrot.slane %v339_v29, 1 }
  0x35   : > { %618 = vrot.lane.b32.xlu1 %v2559_v41, %s2438_s13  ;;  %582 = vrot.lane.b32.xlu0 %v438_v42, %s2437_s12  ;;  %v386_v39 = vsel %vm361_vm1, %v383_v31, %v385_v37 }
  0x39   : > { %501 = vrot.lane.b32.xlu1 %v2559_v41, %s2433_s8  ;;  %465 = vrot.lane.b32.xlu0 %v438_v42, %s2434_s9  ;;  %v453_v42 = vsel %vm428_vm0, %v450_v36, %v452_v40 }
  0x3d   : > { %660 = vrot.lane.b32.xlu1 %v374_v53, %s2439_s29  ;;  %620 = vrot.lane.b32.xlu0 %v2562_v43, %s2438_s13 }
  0x41   : > { %543 = vrot.lane.b32.xlu1 %v374_v53, %s2436_s11  ;;  %503 = vrot.lane.b32.xlu0 %v2562_v43, %s2433_s8 }
  0x45   : > { %701 = vrot.lane.b32.xlu1 %v441_v60, %s2440_s14  ;;  %662 = vrot.lane.b32.xlu0 %v376_v61, %s2439_s29 }
  0x49   : > { %545 = vrot.lane.b32.xlu1 %v376_v61, %s2436_s11  ;;  %400 = vrot.lane.b32.xlu0 %v374_v53, %s2435_s10 }
  0x4d   : > { %703 = vrot.lane.b32.xlu1 %v443_v63, %s2440_s14  ;;  %584 = vrot.lane.b32.xlu0 %v441_v60, %s2437_s12 }
  0x51   : > { %467 = vrot.lane.b32.xlu1 %v441_v60, %s2434_s9  ;;  %402 = vrot.lane.b32.xlu0 %v376_v61, %s2435_s10  ;;  %v2704_v60 = vsel %vm361_vm1, %v387_v55, %v388_v56  ;;  %v336_v61 = vmul.f32 1.7139589, %v312_v57  ;;  %v578_v55 = vrot.slane %v339_v29, 2 }
  0x53   : > { %v390_v2 = vrot.slane %v336_v61, 1  ;;  %v457_v18 = vrot.slane %v336_v61, 2 }
  0x55   : > { %622 = vrot.lane.b32.xlu1 %v2612_v4, %s2438_s13  ;;  %586 = vrot.lane.b32.xlu0 %v443_v63, %s2437_s12  ;;  %v2724_v8 = vsel %vm361_vm1, %v388_v56, %v390_v2  ;;  %v458_v24 = vsel %vm428_vm0, %v455_v1, %v457_v18  ;;  %v292_v18 = vld [vmem:[%s2512_s7 + $0xa8] sm:$0xff] }
  0x59   : > { %505 = vrot.lane.b32.xlu1 %v2612_v4, %s2433_s8  ;;  %469 = vrot.lane.b32.xlu0 %v443_v63, %s2434_s9 }
  0x5d   : > { %664 = vrot.lane.b32.xlu1 %v379_v10, %s2439_s29  ;;  %624 = vrot.lane.b32.xlu0 %v2614_v5, %s2438_s13 }
  0x61   : > { %547 = vrot.lane.b32.xlu1 %v379_v10, %s2436_s11  ;;  %507 = vrot.lane.b32.xlu0 %v2614_v5, %s2433_s8 }
  0x65   : > { %705 = vrot.lane.b32.xlu1 %v446_v19, %s2440_s14  ;;  %666 = vrot.lane.b32.xlu0 %v381_v20, %s2439_s29 }
  0x69   : > { %549 = vrot.lane.b32.xlu1 %v381_v20, %s2436_s11  ;;  %404 = vrot.lane.b32.xlu0 %v379_v10, %s2435_s10 }
  0x6d   : > { %707 = vrot.lane.b32.xlu1 %v448_v22, %s2440_s14  ;;  %588 = vrot.lane.b32.xlu0 %v446_v19, %s2437_s12 }
  0x71   : > { %471 = vrot.lane.b32.xlu1 %v446_v19, %s2434_s9  ;;  %406 = vrot.lane.b32.xlu0 %v381_v20, %s2435_s10  ;;  %v314_v19 = vmax.f32 %v290_v15, 0.0  ;;  %v313_v20 = vmax.f32 %v289_v16, 0.0 }
  0x73   : > { %v2742_v25 = vmul.f32 1.7139589, %v314_v19  ;;  %v2744_v26 = vmul.f32 1.7139589, %v313_v20 }
  0x75   : > { %626 = vrot.lane.b32.xlu1 %v2647_v27, %s2438_s13  ;;  %590 = vrot.lane.b32.xlu0 %v448_v22, %s2437_s12  ;;  %v534_v35 = vrot.slane %v2744_v26, 1  ;;  %v575_v40 = vrot.slane %v2744_v26, 2 }
  0x79   : > { %509 = vrot.lane.b32.xlu1 %v2647_v27, %s2433_s8  ;;  %473 = vrot.lane.b32.xlu0 %v448_v22, %s2434_s9 }
  0x7d   : > { %668 = vrot.lane.b32.xlu1 %v384_v33, %s2439_s29  ;;  %628 = vrot.lane.b32.xlu0 %v2649_v28, %s2438_s13 }
  0x81   : > { %551 = vrot.lane.b32.xlu1 %v384_v33, %s2436_s11  ;;  %511 = vrot.lane.b32.xlu0 %v2649_v28, %s2433_s8 }
  0x85   : > { %709 = vrot.lane.b32.xlu1 %v451_v38, %s2440_s14  ;;  %670 = vrot.lane.b32.xlu0 %v386_v39, %s2439_s29 }
  0x89   : > { %553 = vrot.lane.b32.xlu1 %v386_v39, %s2436_s11  ;;  %408 = vrot.lane.b32.xlu0 %v384_v33, %s2435_s10  ;;  %v535_v33 = vrot.slane %v2742_v25, 1 }
  0x8d   : > { %711 = vrot.lane.b32.xlu1 %v453_v42, %s2440_s14  ;;  %592 = vrot.lane.b32.xlu0 %v451_v38, %s2437_s12 }
  0x8f   : > { %v2680_v48 = vpop.permute.xlu1 %499  ;;  %v2682_v49 = vpop.permute.xlu0 %497 }
  0x91   : > { %475 = vrot.lane.b32.xlu1 %v451_v38, %s2434_s9  ;;  %410 = vrot.lane.b32.xlu0 %v386_v39, %s2435_s10  ;;  %v536_v39 = vsel %vm361_vm1, %v534_v35, %v535_v33 }
  0x93   : > { %v460_v52 = vpop.permute.xlu1 %459  ;;  %v393_v53 = vpop.permute.xlu0 %392 }
  0x94   : > { %v738_v32 = vsel %vm737_vm3, %v2524_v13, %v393_v53  ;;  %v538_v13 = vsel %vm361_vm1, %v535_v33, %v537_v34 }
  0x95   : > { %630 = vrot.lane.b32.xlu1 %v2686_v50, %s2438_s13  ;;  %594 = vrot.lane.b32.xlu0 %v453_v42, %s2437_s12  ;;  %v751_v38 = vsel %vm750_vm4, %v738_v32, %v460_v52 }
  0x96   : > { %v764_v44 = vsel %vm763_vm5, %v751_v38, %v2682_v49 }
  0x97   : > { %v2696_v58 = vpop.permute.xlu1 %461  ;;  %v2698_v59 = vpop.permute.xlu0 %394 }
  0x98   : > { %v739_v52 = vsel %vm737_vm3, %v2526_v14, %v2698_v59 }
  0x99   : > { %513 = vrot.lane.b32.xlu1 %v2686_v50, %s2433_s8  ;;  %477 = vrot.lane.b32.xlu0 %v453_v42, %s2434_s9  ;;  %v576_v42 = vrot.slane %v2742_v25, 2  ;;  %v752_v14 = vsel %vm750_vm4, %v739_v52, %v2696_v58 }
  0x9a   : > { %v765_v0 = vsel %vm763_vm5, %v752_v14, %v2680_v48 }
  0x9b   : > { %v2706_v62 = vpop.permute.xlu1 %396  ;;  %v540_v63 = vpop.permute.xlu0 %539  ;;  %v577_v54 = vsel %vm428_vm0, %v575_v40, %v576_v42 }
  0x9c   : > { %v777_v47 = vsel %vm776_vm6, %v764_v44, %v540_v63  ;;  %v579_v63 = vsel %vm428_vm0, %v576_v42, %v578_v55 }
  0x9d   : > { %672 = vrot.lane.b32.xlu1 %v2704_v60, %s2439_s29  ;;  %632 = vrot.lane.b32.xlu0 %v2688_v51, %s2438_s13 }
  0x9f   : > { %v581_v3 = vpop.permute.xlu1 %580  ;;  %v2714_v6 = vpop.permute.xlu0 %541 }
  0xa0   : > { %v790_v53 = vsel %vm789_vm7, %v777_v47, %v581_v3  ;;  %v778_v2 = vsel %vm776_vm6, %v765_v0, %v2714_v6  ;;  %v293_v6 = vld [vmem:[%s2512_s7 + $0xb0] sm:$0xff] }
  0xa1   : > { %555 = vrot.lane.b32.xlu1 %v2704_v60, %s2436_s11  ;;  %515 = vrot.lane.b32.xlu0 %v2688_v51, %s2433_s8  ;;  %v317_v21 = vmax.f32 %v293_v6, 0.0 }
  0xa3   : > { %v2726_v9 = vpop.permute.xlu1 %463  ;;  %v2728_v10 = vpop.permute.xlu0 %398  ;;  %v341_v29 = vmul.f32 1.7139589, %v317_v21 }
  0xa5   : > { %713 = vrot.lane.b32.xlu1 %v2721_v7, %s2440_s14  ;;  %674 = vrot.lane.b32.xlu0 %v2724_v8, %s2439_s29  ;;  %v697_v44 = vrot.slane %v341_v29, 2 }
  0xa7   : > { %v619_v22 = vpop.permute.xlu1 %618  ;;  %v583_v23 = vpop.permute.xlu0 %582 }
  0xa8   : > { %v803_v49 = vsel %vm802_vm8, %v790_v53, %v619_v22  ;;  %v316_v22 = vmax.f32 %v292_v18, 0.0 }
  0xa9   : > { %596 = vrot.lane.b32.xlu1 %v2721_v7, %s2437_s12  ;;  %557 = vrot.lane.b32.xlu0 %v2724_v8, %s2436_s11 }
  0xaa   : > { %v340_v32 = vmul.f32 1.7139589, %v316_v22 }
  0xab   : > { %v2746_v30 = vpop.permute.xlu1 %501  ;;  %v2748_v31 = vpop.permute.xlu0 %465 }
  0xac   : > { %v696_v52 = vrot.slane %v340_v32, 2 }
  0xad   : > { %598 = vrot.lane.b32.xlu1 %v458_v24, %s2437_s12  ;;  %715 = vrot.lane.b32.xlu0 %v458_v24, %s2440_s14 }
  0xaf   : > { %v661_v36 = vpop.permute.xlu1 %660  ;;  %v621_v37 = vpop.permute.xlu0 %620 }
  0xb0   : > { %v816_v56 = vsel %vm815_vm9, %v803_v49, %v661_v36  ;;  %v655_v36 = vrot.slane %v340_v32, 1 }
  0xb1   : > { %636 = vrot.lane.b32.xlu1 %v2742_v25, %s2438_s13  ;;  %634 = vrot.lane.b32.xlu0 %v2744_v26, %s2438_s13 }
  0xb3   : > { %v2767_v45 = vpop.permute.xlu1 %543  ;;  %v2769_v46 = vpop.permute.xlu0 %503 }
  0xb5   : > { %678 = vrot.lane.b32.xlu1 %v538_v13, %s2439_s29  ;;  %676 = vrot.lane.b32.xlu0 %v536_v39, %s2439_s29 }
  0xb7   : > { %v702_v57 = vpop.permute.xlu1 %701  ;;  %v663_v61 = vpop.permute.xlu0 %662 }
  0xb8   : > { %v829_v59 = vsel %vm828_vm10, %v816_v56, %v702_v57  ;;  %v698_v56 = vsel %vm428_vm0, %v696_v52, %v697_v44 }
  0xb9   : > { %412 = vrot.lane.b32.xlu1 %v2704_v60, %s2435_s10  ;;  %717 = vrot.lane.b32.xlu0 %v577_v54, %s2440_s14  ;;  %v791_v60 = vsel %vm789_vm7, %v778_v2, %v583_v23 }
  0xba   : > { %2206 = vmatprep.mubr.msk.f32.mxu0 %vm853_vm11, %v829_v59  ;;  %v804_v3 = vsel %vm802_vm8, %v791_v60, %v621_v37 }
  0xbb   : > { %v2791_v1 = vpop.permute.xlu1 %545  ;;  %v2793_v58 = vpop.permute.xlu0 %400  ;;  %v817_v48 = vsel %vm815_vm9, %v804_v3, %v663_v61 }
  0xbc   : > { %v742_v22 = vsel %vm737_vm3, %v2559_v41, %v2793_v58 }
  0xbd   : > { %414 = vrot.lane.b32.xlu1 %v2724_v8, %s2435_s10  ;;  %719 = vrot.lane.b32.xlu0 %v579_v63, %s2440_s14  ;;  %v294_v8 = vld [vmem:[%s2512_s7 + $0xb8] sm:$0x3] }
  0xbe   : > { %v318_v23 = vmax.f32 %v294_v8, 0.0 }
  0xbf   : > { %v704_v15 = vpop.permute.xlu1 %703  ;;  %v585_v16 = vpop.permute.xlu0 %584 }
  0xc0   : > { %v830_v17 = vsel %vm828_vm10, %v817_v48, %v704_v15  ;;  %v342_v33 = vmul.f32 1.7139589, %v318_v23 }
  0xc1   : > { %481 = vrot.lane.b32.xlu1 %v458_v24, %s2434_s9  ;;  %479 = vrot.lane.b32.xlu0 %v2721_v7, %s2434_s9 }
  0xc2   : > { %2207 = vmatmul.mubr.msk.f32.vlgmr.msra.gmra.mrb[0].mxu0 %vm853_vm11, %v830_v17  ;;  %v699_v47 = vrot.slane %v342_v33, 2 }
  0xc3   : > { %v2811_v19 = vpop.permute.xlu1 %467  ;;  %v2813_v20 = vpop.permute.xlu0 %402 }
  0xc4   : > { %v755_v23 = vsel %vm750_vm4, %v742_v22, %v2811_v19  ;;  %v743_v41 = vsel %vm737_vm3, %v2562_v43, %v2813_v20 }
  0xc5   : > { %519 = vrot.lane.b32.xlu1 %v2742_v25, %s2433_s8  ;;  %517 = vrot.lane.b32.xlu0 %v2744_v26, %s2433_s8  ;;  %v656_v25 = vrot.slane %v341_v29, 1  ;;  %v658_v26 = vrot.slane %v342_v33, 1 }
  0xc7   : > { %v623_v24 = vpop.permute.xlu1 %622  ;;  %v587_v7 = vpop.permute.xlu0 %586  ;;  %v657_v40 = vsel %vm361_vm1, %v655_v36, %v656_v25 }
  0xc9   : > { %561 = vrot.lane.b32.xlu1 %v538_v13, %s2436_s11  ;;  %559 = vrot.lane.b32.xlu0 %v536_v39, %s2436_s11  ;;  %v740_v13 = vsel %vm737_vm3, %v2522_v12, %v2706_v62  ;;  %v659_v39 = vsel %vm361_vm1, %v656_v25, %v658_v26 }
  0xca   : > { %v753_v42 = vsel %vm750_vm4, %v740_v13, %v2726_v9  ;;  %v700_v9 = vsel %vm428_vm0, %v697_v44, %v699_v47 }
  0xcb   : > { %v506_v34 = vpop.permute.xlu1 %505  ;;  %v2821_v35 = vpop.permute.xlu0 %469  ;;  %v766_v53 = vsel %vm763_vm5, %v753_v42, %v2746_v30 }
  0xcc   : > { %v779_v12 = vsel %vm776_vm6, %v766_v53, %v2767_v45  ;;  %v741_v45 = vsel %vm737_vm3, %v2520_v11, %v2728_v10  ;;  %v756_v58 = vsel %vm750_vm4, %v743_v41, %v2821_v35 }
  0xcd   : > { %602 = vrot.lane.b32.xlu1 %v579_v63, %s2437_s12  ;;  %600 = vrot.lane.b32.xlu0 %v577_v54, %s2437_s12  ;;  %v792_v62 = vsel %vm789_vm7, %v779_v12, %v585_v16  ;;  %v754_v59 = vsel %vm750_vm4, %v741_v45, %v2748_v31 }
  0xce   : > { %v805_v55 = vsel %vm802_vm8, %v792_v62, %v623_v24  ;;  %v767_v63 = vsel %vm763_vm5, %v754_v59, %v2769_v46  ;;  %v768_v24 = vsel %vm763_vm5, %v755_v23, %v506_v34 }
  0xcf   : > { %v665_v37 = vpop.permute.xlu1 %664  ;;  %v625_v38 = vpop.permute.xlu0 %624  ;;  %v780_v60 = vsel %vm776_vm6, %v767_v63, %v2791_v1 }
  0xd0   : > { %v818_v57 = vsel %vm815_vm9, %v805_v55, %v665_v37  ;;  %v793_v3 = vsel %vm789_vm7, %v780_v60, %v587_v7 }
  0xd1   : > { %640 = vrot.lane.b32.xlu1 %v341_v29, %s2438_s13  ;;  %638 = vrot.lane.b32.xlu0 %v340_v32, %s2438_s13  ;;  %v806_v11 = vsel %vm802_vm8, %v793_v3, %v625_v38 }
  0xd3   : > { %v548_v49 = vpop.permute.xlu1 %547  ;;  %v508_v54 = vpop.permute.xlu0 %507 }
  0xd4   : > { %v781_v32 = vsel %vm776_vm6, %v768_v24, %v548_v49  ;;  %v769_v19 = vsel %vm763_vm5, %v756_v58, %v508_v54 }
  0xd5   : > { %682 = vrot.lane.b32.xlu1 %v659_v39, %s2439_s29  ;;  %680 = vrot.lane.b32.xlu0 %v657_v40, %s2439_s29 }
  0xd7   : > { %v706_v30 = vpop.permute.xlu1 %705  ;;  %v667_v61 = vpop.permute.xlu0 %666 }
  0xd8   : > { %v831_v14 = vsel %vm828_vm10, %v818_v57, %v706_v30  ;;  %v819_v10 = vsel %vm815_vm9, %v806_v11, %v667_v61 }
  0xd9   : > { %723 = vrot.lane.b32.xlu1 %v700_v9, %s2440_s14  ;;  %721 = vrot.lane.b32.xlu0 %v698_v56, %s2440_s14 }
  0xda   : > { %2209 = vmatprep.mubr.msk.f32.mxu0 %vm853_vm11, %v831_v14 }
  0xdb   : > { %v550_v0 = vpop.permute.xlu1 %549  ;;  %v405_v2 = vpop.permute.xlu0 %404 }
  0xdc   : > { %v782_v39 = vsel %vm776_vm6, %v769_v19, %v550_v0  ;;  %v744_v9 = vsel %vm737_vm3, %v2612_v4, %v405_v2 }
  0xdf   : > { %v708_v48 = vpop.permute.xlu1 %707  ;;  %v589_v15 = vpop.permute.xlu0 %588 }
  0xe0   : > { %v832_v31 = vsel %vm828_vm10, %v819_v10, %v708_v48  ;;  %v794_v33 = vsel %vm789_vm7, %v781_v32, %v589_v15 }
  0xe1   : > { %2210 = vmatmul.mubr.msk.f32.gmra.mrb[2].mxu0 %vm853_vm11, %v832_v31 }
  0xe3   : > { %v472_v16 = vpop.permute.xlu1 %471  ;;  %v407_v17 = vpop.permute.xlu0 %406 }
  0xe4   : > { %v757_v56 = vsel %vm750_vm4, %v744_v9, %v472_v16  ;;  %v745_v4 = vsel %vm737_vm3, %v2614_v5, %v407_v17 }
  0xe7   : > { %v627_v46 = vpop.permute.xlu1 %626  ;;  %v591_v6 = vpop.permute.xlu0 %590 }
  0xe8   : > { %v807_v25 = vsel %vm802_vm8, %v794_v33, %v627_v46  ;;  %v795_v40 = vsel %vm789_vm7, %v782_v39, %v591_v6 }
  0xeb   : > { %v510_v18 = vpop.permute.xlu1 %509  ;;  %v474_v8 = vpop.permute.xlu0 %473 }
  0xec   : > { %v770_v57 = vsel %vm763_vm5, %v757_v56, %v510_v18  ;;  %v758_v2 = vsel %vm750_vm4, %v745_v4, %v474_v8 }
  0xef   : > { %v669_v21 = vpop.permute.xlu1 %668  ;;  %v629_v1 = vpop.permute.xlu0 %628 }
  0xf0   : > { %v820_v26 = vsel %vm815_vm9, %v807_v25, %v669_v21  ;;  %v808_v42 = vsel %vm802_vm8, %v795_v40, %v629_v1 }
  0xf3   : > { %v552_v7 = vpop.permute.xlu1 %551  ;;  %v512_v29 = vpop.permute.xlu0 %511 }
  0xf4   : > { %v783_v14 = vsel %vm776_vm6, %v770_v57, %v552_v7  ;;  %v771_v11 = vsel %vm763_vm5, %v758_v2, %v512_v29 }
  0xf7   : > { %v710_v36 = vpop.permute.xlu1 %709  ;;  %v671_v37 = vpop.permute.xlu0 %670 }
  0xf8   : > { %v833_v38 = vsel %vm828_vm10, %v820_v26, %v710_v36  ;;  %v821_v44 = vsel %vm815_vm9, %v808_v42, %v671_v37 }
  0xf9   : > { %2212 = vmatprep.mubr.msk.f32.mxu0 %vm853_vm11, %v833_v38 }
  0xfb   : > { %v554_v34 = vpop.permute.xlu1 %553  ;;  %v409_v13 = vpop.permute.xlu0 %408 }
  0xfc   : > { %v784_v15 = vsel %vm776_vm6, %v771_v11, %v554_v34  ;;  %v746_v21 = vsel %vm737_vm3, %v2647_v27, %v409_v13  ;;  %v2950_v11 = vld [vmem:[%s3482_s2] ss:$0 sm:$0xff] }
  0xff   : > { %v712_v47 = vpop.permute.xlu1 %711  ;;  %v593_v52 = vpop.permute.xlu0 %592 }
 0x100   : > { %v834_v43 = vsel %vm828_vm10, %v821_v44, %v712_v47  ;;  %v796_v45 = vsel %vm789_vm7, %v783_v14, %v593_v52 }
 0x101   : > { %2213 = vmatmul.mubr.msk.f32.gmra.mrb[4].mxu0 %vm853_vm11, %v834_v43 }
 0x103   : > { %v476_v20 = vpop.permute.xlu1 %475  ;;  %v411_v35 = vpop.permute.xlu0 %410 }
 0x104   : > { %v759_v1 = vsel %vm750_vm4, %v746_v21, %v476_v20  ;;  %v747_v29 = vsel %vm737_vm3, %v2649_v28, %v411_v35 }
 0x107   : > { %v631_v53 = vpop.permute.xlu1 %630  ;;  %v595_v49 = vpop.permute.xlu0 %594 }
 0x108   : > { %v809_v59 = vsel %vm802_vm8, %v796_v45, %v631_v53  ;;  %v797_v31 = vsel %vm789_vm7, %v784_v15, %v595_v49 }
 0x10b   : > { %v514_v54 = vpop.permute.xlu1 %513  ;;  %v478_v12 = vpop.permute.xlu0 %477 }
 0x10c   : > { %v772_v22 = vsel %vm763_vm5, %v759_v1, %v514_v54  ;;  %v760_v33 = vsel %vm750_vm4, %v747_v29, %v478_v12 }
 0x10f   : > { %v673_v62 = vpop.permute.xlu1 %672  ;;  %v633_v55 = vpop.permute.xlu0 %632 }
 0x110   : > { %v822_v63 = vsel %vm815_vm9, %v809_v59, %v673_v62  ;;  %v810_v16 = vsel %vm802_vm8, %v797_v31, %v633_v55 }
 0x113   : > { %v556_v30 = vpop.permute.xlu1 %555  ;;  %v516_v61 = vpop.permute.xlu0 %515 }
 0x114   : > { %v785_v7 = vsel %vm776_vm6, %v772_v22, %v556_v30  ;;  %v773_v26 = vsel %vm763_vm5, %v760_v33, %v516_v61 }
 0x117   : > { %v714_v0 = vpop.permute.xlu1 %713  ;;  %v675_v60 = vpop.permute.xlu0 %674 }
 0x118   : > { %v835_v3 = vsel %vm828_vm10, %v822_v63, %v714_v0  ;;  %v823_v46 = vsel %vm815_vm9, %v810_v16, %v675_v60 }
 0x119   : > { %2215 = vmatprep.mubr.msk.f32.mxu0 %vm853_vm11, %v835_v3 }
 0x11b   : > { %v597_v10 = vpop.permute.xlu1 %596  ;;  %v558_v48 = vpop.permute.xlu0 %557 }
 0x11c   : > { %v798_v32 = vsel %vm789_vm7, %v785_v7, %v597_v10  ;;  %v786_v38 = vsel %vm776_vm6, %v773_v26, %v558_v48 }
 0x11f   : > { %v599_v6 = vpop.permute.xlu1 %598  ;;  %v716_v18 = vpop.permute.xlu0 %715 }
 0x120   : > { %v836_v5 = vsel %vm828_vm10, %v823_v46, %v716_v18  ;;  %v799_v58 = vsel %vm789_vm7, %v786_v38, %v599_v6 }
 0x121   : > { %2216 = vmatmul.mubr.msk.f32.gmra.mrb[6].mxu0 %vm853_vm11, %v836_v5 }
 0x123   : > { %v637_v17 = vpop.permute.xlu1 %636  ;;  %v635_v8 = vpop.permute.xlu0 %634 }
 0x124   : > { %v811_v25 = vsel %vm802_vm8, %v798_v32, %v635_v8  ;;  %v812_v28 = vsel %vm802_vm8, %v799_v58, %v637_v17 }
 0x127   : > { %v679_v23 = vpop.permute.xlu1 %678  ;;  %v677_v24 = vpop.permute.xlu0 %676 }
 0x128   : > { %v824_v27 = vsel %vm815_vm9, %v811_v25, %v677_v24  ;;  %v825_v19 = vsel %vm815_vm9, %v812_v28, %v679_v23 }
 0x12b   : > { %v413_v36 = vpop.permute.xlu1 %412  ;;  %v718_v37 = vpop.permute.xlu0 %717 }
 0x12c   : > { %v837_v41 = vsel %vm828_vm10, %v824_v27, %v718_v37  ;;  %v748_v54 = vsel %vm737_vm3, %v2686_v50, %v413_v36 }
 0x12d   : > { %2218 = vmatprep.mubr.msk.f32.mxu0 %vm853_vm11, %v837_v41 }
 0x12f   : > { %v415_v34 = vpop.permute.xlu1 %414  ;;  %v720_v13 = vpop.permute.xlu0 %719 }
 0x130   : > { %v838_v39 = vsel %vm828_vm10, %v825_v19, %v720_v13  ;;  %v749_v12 = vsel %vm737_vm3, %v2688_v51, %v415_v34 }
 0x131   : > { %2219 = vmatmul.mubr.msk.f32.gmra.mrb[8].mxu0 %vm853_vm11, %v838_v39 }
 0x133   : > { %v482_v40 = vpop.permute.xlu1 %481  ;;  %v480_v42 = vpop.permute.xlu0 %479 }
 0x134   : > { %v762_v62 = vsel %vm750_vm4, %v749_v12, %v482_v40  ;;  %v761_v55 = vsel %vm750_vm4, %v748_v54, %v480_v42 }
 0x137   : > { %v520_v44 = vpop.permute.xlu1 %519  ;;  %v518_v47 = vpop.permute.xlu0 %517 }
 0x138   : > { %v775_v9 = vsel %vm763_vm5, %v762_v62, %v520_v44  ;;  %v774_v56 = vsel %vm763_vm5, %v761_v55, %v518_v47 }
 0x13b   : > { %v562_v52 = vpop.permute.xlu1 %561  ;;  %v560_v43 = vpop.permute.xlu0 %559 }
 0x13c   : > { %v788_v61 = vsel %vm776_vm6, %v775_v9, %v562_v52  ;;  %v787_v14 = vsel %vm776_vm6, %v774_v56, %v560_v43 }
 0x13f   : > { %v603_v20 = vpop.permute.xlu1 %602  ;;  %v601_v35 = vpop.permute.xlu0 %600 }
 0x140   : > { %v801_v45 = vsel %vm789_vm7, %v788_v61, %v603_v20  ;;  %v800_v50 = vsel %vm789_vm7, %v787_v14, %v601_v35 }
 0x143   : > { %v641_v53 = vpop.permute.xlu1 %640  ;;  %v639_v49 = vpop.permute.xlu0 %638 }
 0x144   : > { %v814_v51 = vsel %vm802_vm8, %v801_v45, %v641_v53  ;;  %v813_v59 = vsel %vm802_vm8, %v800_v50, %v639_v49 }
 0x147   : > { %v683_v57 = vpop.permute.xlu1 %682  ;;  %v681_v30 = vpop.permute.xlu0 %680 }
 0x148   : > { %v827_v63 = vsel %vm815_vm9, %v814_v51, %v683_v57  ;;  %v826_v0 = vsel %vm815_vm9, %v813_v59, %v681_v30 }
 0x14b   : > { %v724_v60 = vpop.permute.xlu1 %723  ;;  %v722_v3 = vpop.permute.xlu0 %721 }
 0x14c   : > { %v840_v4 = vsel %vm828_vm10, %v827_v63, %v724_v60  ;;  %v839_v2 = vsel %vm828_vm10, %v826_v0, %v722_v3 }
 0x14d   : > { %2221 = vmatprep.mubr.msk.f32.mxu0 %vm853_vm11, %v839_v2 }
 0x14e   : > { %2222 = vmatmul.mubr.msk.f32.gmra.mrb[10].mxu0 %vm853_vm11, %v840_v4 }
 0x195   : > { %v2208_v10 = vpop.f32.mrb[0].mxu0 }
 0x196   : > { %v2953_v48 = vadd.f32 %v2208_v10, %v2950_v11  ;;  %v960_v15 = vpop.f32.mrb[1].mxu0 }
 0x197   : > { %v2956_v31 = vadd.f32 %v2950_v11, %v960_v15 }
 0x198   : > { %v2101_v16 = vmul.f32 -1.442695, %v2953_v48 }
 0x199   : > { %v2100_v46 = vmul.f32 -1.442695, %v2956_v31 }
 0x19a   : > { %2313 = vpow2.f32 %v2101_v16 }
 0x19b   : > { %2315 = vpow2.f32 %v2100_v46 }
 0x1a4   : > { %v2314_v6 = vpop.eup %2313 }
 0x1a5   : > { %v2316_v18 = vpop.eup %2315  ;;  %v1056_v5 = vadd.f32 1.0, %v2314_v6 }
 0x1a6   : > { %v1055_v17 = vadd.f32 1.0, %v2316_v18 }
 0x1a7   : > { %2317 = vrcp.f32 %v1056_v5 }
 0x1a8   : > { %2319 = vrcp.f32 %v1055_v17 }
 0x1b1   : > { %v2318_v8 = vpop.eup %2317 }
 0x1b2   : > { %v2320_v21 = vpop.eup %2319  ;;  %1105 = vrot.lane.b32.xlu1 %v2318_v8, %s2441_s17 }
 0x1b3   : > { %1103 = vrot.lane.b32.xlu0 %v2320_v21, %s2441_s17 }
 0x1b4   : > { %v2211_v1 = vpop.f32.mrb[2].mxu0 }
 0x1b5   : > { %v2963_v22 = vadd.f32 %v2211_v1, %v2950_v11  ;;  %v970_v23 = vpop.f32.mrb[3].mxu0 }
 0x1b6   : > { %v2966_v24 = vadd.f32 %v2950_v11, %v970_v23 }
 0x1b7   : > { %v2103_v7 = vmul.f32 -1.442695, %v2963_v22 }
 0x1b8   : > { %v2102_v29 = vmul.f32 -1.442695, %v2966_v24 }
 0x1b9   : > { %2321 = vpow2.f32 %v2103_v7 }
 0x1ba   : > { %2323 = vpow2.f32 %v2102_v29 }
 0x1c3   : > { %v2322_v32 = vpop.eup %2321 }
 0x1c4   : > { %v2324_v33 = vpop.eup %2323  ;;  %v1058_v25 = vadd.f32 1.0, %v2322_v32 }
 0x1c5   : > { %v1057_v26 = vadd.f32 1.0, %v2324_v33 }
 0x1c6   : > { %2325 = vrcp.f32 %v1058_v25 }
 0x1c7   : > { %2327 = vrcp.f32 %v1057_v26 }
 0x1d0   : > { %v2326_v27 = vpop.eup %2325 }
 0x1d1   : > { %v2328_v36 = vpop.eup %2327  ;;  %1109 = vrot.lane.b32.xlu1 %v2326_v27, %s2441_s17 }
 0x1d2   : > { %1107 = vrot.lane.b32.xlu0 %v2328_v36, %s2441_s17 }
 0x1d4   : > { %v2214_v37 = vpop.f32.mrb[4].mxu0 }
 0x1d5   : > { %v2973_v38 = vadd.f32 %v2214_v37, %v2950_v11  ;;  %v980_v41 = vpop.f32.mrb[5].mxu0 }
 0x1d6   : > { %v2976_v58 = vadd.f32 %v2950_v11, %v980_v41 }
 0x1d7   : > { %v2105_v28 = vmul.f32 -1.442695, %v2973_v38 }
 0x1d8   : > { %v2104_v19 = vmul.f32 -1.442695, %v2976_v58 }
 0x1d9   : > { %2329 = vpow2.f32 %v2105_v28 }
 0x1da   : > { %2331 = vpow2.f32 %v2104_v19 }
 0x1e3   : > { %v2330_v34 = vpop.eup %2329 }
 0x1e4   : > { %v2332_v13 = vpop.eup %2331  ;;  %v1060_v39 = vadd.f32 1.0, %v2330_v34 }
 0x1e5   : > { %v1059_v40 = vadd.f32 1.0, %v2332_v13 }
 0x1e6   : > { %2333 = vrcp.f32 %v1060_v39 }
 0x1e7   : > { %2335 = vrcp.f32 %v1059_v40 }
 0x1f0   : > { %v2334_v42 = vpop.eup %2333 }
 0x1f1   : > { %v2336_v44 = vpop.eup %2335  ;;  %1113 = vrot.lane.b32.xlu1 %v2334_v42, %s2441_s17 }
 0x1f2   : > { %1111 = vrot.lane.b32.xlu0 %v2336_v44, %s2441_s17 }
 0x1f4   : > { %v2217_v47 = vpop.f32.mrb[6].mxu0 }
 0x1f5   : > { %v2983_v52 = vadd.f32 %v2217_v47, %v2950_v11  ;;  %v990_v43 = vpop.f32.mrb[7].mxu0 }
 0x1f6   : > { %v2986_v20 = vadd.f32 %v2950_v11, %v990_v43 }
 0x1f7   : > { %v2107_v35 = vmul.f32 -1.442695, %v2983_v52 }
 0x1f8   : > { %v2106_v53 = vmul.f32 -1.442695, %v2986_v20 }
 0x1f9   : > { %2337 = vpow2.f32 %v2107_v35 }
 0x1fa   : > { %2339 = vpow2.f32 %v2106_v53 }
 0x203   : > { %v2338_v49 = vpop.eup %2337 }
 0x204   : > { %v2340_v54 = vpop.eup %2339  ;;  %v1062_v12 = vadd.f32 1.0, %v2338_v49  ;;  %v2220_v62 = vpop.f32.mrb[8].mxu0 }
 0x205   : > { %v1061_v55 = vadd.f32 1.0, %v2340_v54  ;;  %v2991_v9 = vadd.f32 %v2220_v62, %v2950_v11  ;;  %v1000_v56 = vpop.f32.mrb[9].mxu0 }
 0x206   : > { %2341 = vrcp.f32 %v1062_v12  ;;  %v2994_v57 = vadd.f32 %v2950_v11, %v1000_v56 }
 0x207   : > { %2343 = vrcp.f32 %v1061_v55  ;;  %v2109_v30 = vmul.f32 -1.442695, %v2991_v9 }
 0x208   : > { %v2108_v61 = vmul.f32 -1.442695, %v2994_v57 }
 0x209   : > { %2345 = vpow2.f32 %v2109_v30 }
 0x20a   : > { %2347 = vpow2.f32 %v2108_v61 }
 0x210   : > { %v2342_v14 = vpop.eup %2341 }
 0x211   : > { %v2344_v45 = vpop.eup %2343  ;;  %1117 = vrot.lane.b32.xlu1 %v2342_v14, %s2441_s17 }
 0x212   : > { %1115 = vrot.lane.b32.xlu0 %v2344_v45, %s2441_s17 }
 0x213   : > { %v2346_v50 = vpop.eup %2345 }
 0x214   : > { %v2348_v51 = vpop.eup %2347  ;;  %v1064_v59 = vadd.f32 1.0, %v2346_v50 }
 0x215   : > { %v1063_v63 = vadd.f32 1.0, %v2348_v51 }
 0x216   : > { %2349 = vrcp.f32 %v1064_v59 }
 0x217   : > { %2351 = vrcp.f32 %v1063_v63 }
 0x220   : > { %v2350_v0 = vpop.eup %2349 }
 0x221   : > { %v2352_v60 = vpop.eup %2351  ;;  %1121 = vrot.lane.b32.xlu1 %v2350_v0, %s2441_s17  ;;  %v2223_v3 = vpop.f32.mrb[10].mxu0 }
 0x222   : > { %v3002_v4 = vadd.f32 %v2223_v3, %v2950_v11  ;;  %1119 = vrot.lane.b32.xlu0 %v2352_v60, %s2441_s17  ;;  %v1010_v2 = vpop.f32.mrb[11].mxu0 }
 0x223   : > { %v3006_v10 = vadd.f32 %v2950_v11, %v1010_v2 }
 0x224   : > { %v2111_v15 = vmul.f32 -1.442695, %v3002_v4  ;;  %v1106_v16 = vpop.permute.xlu1 %1105 }
 0x225   : > { %v2110_v46 = vmul.f32 -1.442695, %v3006_v10  ;;  %v1140_v6 = vmul.f32 %v1106_v16, %v2953_v48  ;;  %v1104_v18 = vpop.permute.xlu0 %1103 }
 0x226   : > { %2353 = vpow2.f32 %v2111_v15  ;;  %v1139_v5 = vmul.f32 %v1104_v18, %v2956_v31 }
 0x227   : > { %2355 = vpow2.f32 %v2110_v46  ;;  %v1152_v17 = vmul.f32 1.8, %v1140_v6 }
 0x228   : > { %v1151_v8 = vmul.f32 1.8, %v1139_v5 }
 0x229   : > { %v1164_v21 = vmax.f32 %v1152_v17, 0.0 }
 0x22a   : > { %v1163_v1 = vmax.f32 %v1151_v8, 0.0 }
 0x22b   : > { %v1176_v23 = vmul.f32 1.7139589, %v1164_v21 }
 0x22c   : > { %v1175_v11 = vmul.f32 1.7139589, %v1163_v1 }
 0x22d   : > { %1189 = vst.msk [vmem:[#allocation2 + $0x21] sm:$0xff] %vm737_vm3, %v1176_v23 }
 0x22e   : > { %1208 = vst.msk [vmem:[#allocation2 + $0x23] sm:$0x40] %vm1207_vm12, %v1176_v23 }
 0x22f   : > { %1188 = vst.msk [vmem:[#allocation2 + $0x19] sm:$0xff] %vm737_vm3, %v1175_v11 }
 0x230   : > { %1201 = vst.msk [vmem:[#allocation2 + $0x17] sm:$0x2] %vm1200_vm13, %v1175_v11  ;;  %v2354_v48 = vpop.eup %2353 }
 0x231   : > { %v2356_v7 = vpop.eup %2355  ;;  %v1066_v31 = vadd.f32 1.0, %v2354_v48 }
 0x232   : > { %v1065_v29 = vadd.f32 1.0, %v2356_v7 }
 0x233   : > { %2357 = vrcp.f32 %v1066_v31 }
 0x234   : > { %2359 = vrcp.f32 %v1065_v29 }
 0x23d   : > { %v2358_v32 = vpop.eup %2357 }
 0x23e   : > { %v2360_v33 = vpop.eup %2359  ;;  %1125 = vrot.lane.b32.xlu1 %v2358_v32, %s2441_s17 }
 0x23f   : > { %1123 = vrot.lane.b32.xlu0 %v2360_v33, %s2441_s17 }
 0x243   : > { %v1110_v25 = vpop.permute.xlu1 %1109 }
 0x244   : > { %v1142_v26 = vmul.f32 %v1110_v25, %v2963_v22  ;;  %v1108_v27 = vpop.permute.xlu0 %1107 }
 0x245   : > { %v1141_v36 = vmul.f32 %v1108_v27, %v2966_v24 }
 0x246   : > { %v1154_v37 = vmul.f32 1.8, %v1142_v26 }
 0x247   : > { %v1153_v41 = vmul.f32 1.8, %v1141_v36 }
 0x248   : > { %v1166_v28 = vmax.f32 %v1154_v37, 0.0 }
 0x249   : > { %v1165_v19 = vmax.f32 %v1153_v41, 0.0 }
 0x24a   : > { %v1178_v34 = vmul.f32 1.7139589, %v1166_v28 }
 0x24b   : > { %v1177_v13 = vmul.f32 1.7139589, %v1165_v19 }
 0x24c   : > { %1191 = vst.msk [vmem:[#allocation2 + $0x39] sm:$0xff] %vm737_vm3, %v1178_v34 }
 0x24d   : > { %1209 = vst.msk [vmem:[#allocation2 + $0x3b] sm:$0x40] %vm1207_vm12, %v1178_v34 }
 0x24e   : > { %1190 = vst.msk [vmem:[#allocation2 + $0x31] sm:$0xff] %vm737_vm3, %v1177_v13 }
 0x24f   : > { %1202 = vst.msk [vmem:[#allocation2 + $0x2f] sm:$0x2] %vm1200_vm13, %v1177_v13 }
 0x254   : > { %v1217_v39 = vld [vmem:[#allocation2 + $0x40] sm:$0x3] }
 0x255   : > { %v1216_v40 = vld [vmem:[#allocation2 + $0x38] sm:$0xff]  ;;  %1221 = vst.msk [vmem:[#allocation2 + $0x10] sm:$0x3] %vm1220_vm14, %v1217_v39 }
 0x256   : > { %v1215_v22 = vld [vmem:[#allocation2 + $0x30] sm:$0xff]  ;;  %1219 = vst.msk [vmem:[#allocation2 + $0x8] sm:$0xff] %vm737_vm3, %v1216_v40 }
 0x257   : > { %1218 = vst.msk [vmem:[#allocation2] sm:$0xff] %vm737_vm3, %v1215_v22 }
 0x263   : > { %v1114_v24 = vpop.permute.xlu1 %1113 }
 0x264   : > { %v1144_v42 = vmul.f32 %v1114_v24, %v2973_v38  ;;  %v1112_v44 = vpop.permute.xlu0 %1111 }
 0x265   : > { %v1143_v47 = vmul.f32 %v1112_v44, %v2976_v58 }
 0x266   : > { %v1156_v43 = vmul.f32 1.8, %v1144_v42 }
 0x267   : > { %v1155_v35 = vmul.f32 1.8, %v1143_v47 }
 0x268   : > { %v1168_v53 = vmax.f32 %v1156_v43, 0.0 }
 0x269   : > { %v1167_v49 = vmax.f32 %v1155_v35, 0.0 }
 0x26a   : > { %v1180_v54 = vmul.f32 1.7139589, %v1168_v53 }
 0x26b   : > { %v1179_v12 = vmul.f32 1.7139589, %v1167_v49 }
 0x26c   : > { %1193 = vst.msk [vmem:[#allocation2 + $0x51] sm:$0xff] %vm737_vm3, %v1180_v54 }
 0x26d   : > { %1210 = vst.msk [vmem:[#allocation2 + $0x53] sm:$0x40] %vm1207_vm12, %v1180_v54 }
 0x26e   : > { %1192 = vst.msk [vmem:[#allocation2 + $0x49] sm:$0xff] %vm737_vm3, %v1179_v12 }
 0x26f   : > { %1203 = vst.msk [vmem:[#allocation2 + $0x47] sm:$0x2] %vm1200_vm13, %v1179_v12 }
 0x283   : > { %v1118_v62 = vpop.permute.xlu1 %1117 }
 0x284   : > { %v1146_v38 = vmul.f32 %v1118_v62, %v2983_v52  ;;  %v1116_v55 = vpop.permute.xlu0 %1115 }
 0x285   : > { %v1145_v58 = vmul.f32 %v1116_v55, %v2986_v20 }
 0x286   : > { %v1158_v56 = vmul.f32 1.8, %v1146_v38 }
 0x287   : > { %v1157_v30 = vmul.f32 1.8, %v1145_v58 }
 0x288   : > { %v1170_v61 = vmax.f32 %v1158_v56, 0.0 }
 0x289   : > { %v1169_v14 = vmax.f32 %v1157_v30, 0.0 }
 0x28a   : > { %v1182_v45 = vmul.f32 1.7139589, %v1170_v61 }
 0x28b   : > { %v1181_v50 = vmul.f32 1.7139589, %v1169_v14 }
 0x28c   : > { %1195 = vst.msk [vmem:[#allocation2 + $0x69] sm:$0xff] %vm737_vm3, %v1182_v45 }
 0x28d   : > { %1211 = vst.msk [vmem:[#allocation2 + $0x6b] sm:$0x40] %vm1207_vm12, %v1182_v45 }
 0x28e   : > { %1194 = vst.msk [vmem:[#allocation2 + $0x61] sm:$0xff] %vm737_vm3, %v1181_v50 }
 0x28f   : > { %1204 = vst.msk [vmem:[#allocation2 + $0x5f] sm:$0x2] %vm1200_vm13, %v1181_v50 }
 0x293   : > { %v1122_v51 = vpop.permute.xlu1 %1121 }
 0x294   : > { %v1148_v52 = vmul.f32 %v1122_v51, %v2991_v9  ;;  %v1120_v59 = vpop.permute.xlu0 %1119 }
 0x295   : > { %v1147_v20 = vmul.f32 %v1120_v59, %v2994_v57 }
 0x296   : > { %v1160_v63 = vmul.f32 1.8, %v1148_v52 }
 0x297   : > { %v1159_v0 = vmul.f32 1.8, %v1147_v20 }
 0x298   : > { %v1172_v60 = vmax.f32 %v1160_v63, 0.0 }
 0x299   : > { %v1171_v3 = vmax.f32 %v1159_v0, 0.0 }
 0x29a   : > { %v1184_v2 = vmul.f32 1.7139589, %v1172_v60 }
 0x29b   : > { %v1183_v15 = vmul.f32 1.7139589, %v1171_v3 }
 0x29c   : > { %1197 = vst.msk [vmem:[#allocation2 + $0x81] sm:$0xff] %vm737_vm3, %v1184_v2 }
 0x29d   : > { %1212 = vst.msk [vmem:[#allocation2 + $0x83] sm:$0x40] %vm1207_vm12, %v1184_v2 }
 0x29e   : > { %1196 = vst.msk [vmem:[#allocation2 + $0x79] sm:$0xff] %vm737_vm3, %v1183_v15 }
 0x29f   : > { %1205 = vst.msk [vmem:[#allocation2 + $0x77] sm:$0x2] %vm1200_vm13, %v1183_v15 }
 0x2a4   : > { %v1225_v16 = vld [vmem:[#allocation2 + $0x88] sm:$0x3] }
 0x2a5   : > { %v1224_v57 = vld [vmem:[#allocation2 + $0x80] sm:$0xff]  ;;  %1229 = vst.msk [vmem:[#allocation2 + $0xb8] sm:$0x3] %vm1220_vm14, %v1225_v16 }
 0x2a6   : > { %v1223_v9 = vld [vmem:[#allocation2 + $0x78] sm:$0xff]  ;;  %1228 = vst.msk [vmem:[#allocation2 + $0xb0] sm:$0xff] %vm737_vm3, %v1224_v57 }
 0x2a7   : > { %1227 = vst.msk [vmem:[#allocation2 + $0xa8] sm:$0xff] %vm737_vm3, %v1223_v9 }
 0x2b0   : > { %v1126_v46 = vpop.permute.xlu1 %1125 }
 0x2b1   : > { %v1150_v6 = vmul.f32 %v1126_v46, %v3002_v4  ;;  %v1124_v18 = vpop.permute.xlu0 %1123 }
 0x2b2   : > { %v1149_v5 = vmul.f32 %v1124_v18, %v3006_v10 }
 0x2b3   : > { %v1162_v17 = vmul.f32 1.8, %v1150_v6 }
 0x2b4   : > { %v1161_v8 = vmul.f32 1.8, %v1149_v5 }
 0x2b5   : > { %v1174_v21 = vmax.f32 %v1162_v17, 0.0 }
 0x2b6   : > { %v1173_v1 = vmax.f32 %v1161_v8, 0.0 }
 0x2b7   : > { %v1186_v23 = vmul.f32 1.7139589, %v1174_v21 }
 0x2b8   : > { %v1185_v11 = vmul.f32 1.7139589, %v1173_v1  ;;  %v1686_v1 = vld [vmem:[%s3483_s3] sm:$0xff] }
 0x2b9   : > { %1199 = vst.msk [vmem:[#allocation2 + $0x99] sm:$0xff] %vm737_vm3, %v1186_v23 }
 0x2ba   : > { %1213 = vst.msk [vmem:[#allocation2 + $0x9b] sm:$0x40] %vm1207_vm12, %v1186_v23  ;;  %v1687_v23 = vld [vmem:[%s3483_s3 + $0x8] sm:$0xff] }
 0x2bb   : > { %1198 = vst.msk [vmem:[#allocation2 + $0x91] sm:$0xff] %vm737_vm3, %v1185_v11 }
 0x2bc   : > { %1206 = vst.msk [vmem:[#allocation2 + $0x8f] sm:$0x2] %vm1200_vm13, %v1185_v11  ;;  %v2254_v11 = vpack.c.bf16 %v1687_v23, %v1686_v1 }
 0x2be   : > { %2255 = vmatprep.subr.bf16.mxu1 %v2254_v11 }
 0x2bf   : > { %2257 = vmatpush3.bf16.msra.mxu1 %v2254_v11 }
 0x2c3   : > { %v3065_v4 = vld [vmem:[%s3062_s30 + $0x20] sm:$0xff]  ;;  %v3068_v10 = vld [vmem:[%s3062_s30 + $0x18] sm:$0xff]  ;;  %v3075_v48 = vld [vmem:[%s3062_s30 + $0x30] sm:$0xff] }
 0x2c4   : > { %1384 = vrot.lane.b32.xlu1 %v3065_v4, %s2433_s8  ;;  %1382 = vrot.lane.b32.xlu0 %v3068_v10, %s2433_s8  ;;  %v3078_v7 = vld [vmem:[%s3062_s30 + $0x38] sm:$0xff]  ;;  %v2130_v31 = vld [vmem:[%s3062_s30 + $0x60] sm:$0xff]  ;;  %v1411_v3 = vrot.slane %v3065_v4, 1  ;;  %v1410_v2 = vrot.slane %v3068_v10, 1  ;;  %v1455_v57 = vrot.slane %v3065_v4, 2  ;;  %v1454_v46 = vrot.slane %v3068_v10, 2 }
 0x2c5   : > { %v2131_v29 = vld [vmem:[%s3062_s30 + $0x68] sm:$0xff]  ;;  %v3094_v33 = vld [vmem:[%s3062_s30 + $0x50] sm:$0xff]  ;;  %v1544_v25 = vrot.slane %v2130_v31, 1  ;;  %v2134_v27 = vld [vmem:[%s3062_s30 + $0x80] sm:$0xff]  ;;  %v1588_v37 = vrot.slane %v2130_v31, 2 }
 0x2c6   : > { %v3091_v32 = vld [vmem:[%s3062_s30 + $0x48] sm:$0xff]  ;;  %v1545_v26 = vrot.slane %v2131_v29, 1  ;;  %v2133_v36 = vld [vmem:[%s3062_s30 + $0x78] sm:$0xff]  ;;  %v1589_v41 = vrot.slane %v2131_v29, 2  ;;  %v2132_v28 = vld [vmem:[%s3062_s30 + $0x70] sm:$0x3]  ;;  %v1293_v6 = vsel %vm361_vm1, %v1410_v2, %v1411_v3  ;;  %v1456_v17 = vsel %vm428_vm0, %v1454_v46, %v1455_v57 }
 0x2c7   : > { %v2123_v19 = vld [vmem:[%s3062_s30 + $0x70] sm:$0x3]  ;;  %v1550_v34 = vrot.slane %v2134_v27, 1  ;;  %v1549_v13 = vrot.slane %v2133_v36, 1  ;;  %v2135_v22 = vld [vmem:[%s3062_s30 + $0x88] sm:$0x3] }
 0x2c8   : > { %1506 = vrot.lane.b32.xlu1 %v3075_v48, %s2438_s13  ;;  %1508 = vrot.lane.b32.xlu0 %v3078_v7, %s2438_s13  ;;  %v3105_v39 = vsel %vm361_vm1, %v1544_v25, %v1545_v26  ;;  %v1594_v40 = vrot.slane %v2134_v27, 2  ;;  %v1593_v24 = vrot.slane %v2133_v36, 2  ;;  %v3113_v42 = vsel %vm428_vm0, %v1588_v37, %v1589_v41  ;;  %v3142_v61 = vld [vmem:[%s3062_s30 + $0x8] sm:$0xff]  ;;  %v1234_v14 = vld [vmem:[%s3062_s30 + $0x10] sm:$0x3] }
 0x2c9   : > { %v1547_v44 = vrot.slane %v2132_v28, 1  ;;  %v1428_v47 = vrot.slane %v2123_v19, 1  ;;  %v1472_v43 = vrot.slane %v2123_v19, 2  ;;  %v1591_v35 = vrot.slane %v2132_v28, 2  ;;  %v3148_v45 = vld [vmem:[%s3062_s30] sm:$0xff] }
 0x2ca   : > { %v1552_v53 = vrot.slane %v2135_v22, 1  ;;  %v3122_v12 = vsel %vm361_vm1, %v1549_v13, %v1550_v34  ;;  %v1596_v62 = vrot.slane %v2135_v22, 2  ;;  %v3139_v30 = vsel %vm428_vm0, %v1593_v24, %v1594_v40  ;;  %v2114_v9 = vld [vmem:[%s3062_s30 + $0x28] sm:$0x3]  ;;  %v2126_v13 = vld [vmem:[%s3062_s30 + $0x40] sm:$0x3] }
 0x2cb   : > { %v3116_v49 = vsel %vm361_vm1, %v1545_v26, %v1547_v44  ;;  %v3119_v54 = vsel %vm361_vm1, %v1545_v26, %v1428_v47  ;;  %v3127_v38 = vsel %vm428_vm0, %v1589_v41, %v1472_v43  ;;  %v3130_v55 = vsel %vm428_vm0, %v1589_v41, %v1591_v35  ;;  %v1237_v5 = vld [vmem:[%s3062_s30 + $0x28] sm:$0x3]  ;;  %v2117_v47 = vld [vmem:[%s3062_s30 + $0x40] sm:$0x3]  ;;  %v1243_v1 = vld [vmem:[%s3062_s30 + $0x58] sm:$0x3] }
 0x2cc   : > { %1386 = vrot.lane.b32.xlu1 %v3075_v48, %s2433_s8  ;;  %1388 = vrot.lane.b32.xlu0 %v3078_v7, %s2433_s8  ;;  %v3133_v58 = vsel %vm361_vm1, %v1550_v34, %v1552_v53  ;;  %v3136_v56 = vsel %vm428_vm0, %v1594_v40, %v1596_v62  ;;  %v1287_v50 = vrot.slane %v3142_v61, 1  ;;  %v1289_v51 = vrot.slane %v1234_v14, 1  ;;  %v1690_v34 = vld [vmem:[%s3483_s3 + $0x20] sm:$0xf] }
 0x2cd   : > { %v1286_v52 = vrot.slane %v3148_v45, 1  ;;  %v1331_v59 = vrot.slane %v3142_v61, 2  ;;  %v1333_v0 = vrot.slane %v1234_v14, 2  ;;  %v1330_v60 = vrot.slane %v3148_v45, 2 }
 0x2ce   : > { %v1290_v20 = vsel %vm361_vm1, %v1287_v50, %v1289_v51  ;;  %v1413_v18 = vrot.slane %v2114_v9, 1  ;;  %v1294_v21 = vrot.slane %v1237_v5, 1  ;;  %v1457_v26 = vrot.slane %v2114_v9, 2 }
 0x2cf   : > { %v1288_v63 = vsel %vm361_vm1, %v1286_v52, %v1287_v50  ;;  %v1334_v15 = vsel %vm428_vm0, %v1331_v59, %v1333_v0  ;;  %v1332_v16 = vsel %vm428_vm0, %v1330_v60, %v1331_v59  ;;  %v1338_v19 = vrot.slane %v1237_v5, 2  ;;  %v1240_v50 = vld [vmem:[%s3062_s30 + $0x40] sm:$0x3] }
 0x2d0   : > { %1510 = vrot.lane.b32.xlu1 %v3091_v32, %s2438_s13  ;;  %1512 = vrot.lane.b32.xlu0 %v3094_v33, %s2438_s13  ;;  %v1414_v8 = vsel %vm361_vm1, %v1411_v3, %v1413_v18  ;;  %v1295_v25 = vsel %vm361_vm1, %v1411_v3, %v1294_v21  ;;  %v1458_v28 = vsel %vm428_vm0, %v1455_v57, %v1457_v26  ;;  %v1578_v22 = vrot.slane %v3075_v48, 2 }
 0x2d1   : > { %v1579_v40 = vrot.slane %v3078_v7, 2  ;;  %v1339_v24 = vsel %vm428_vm0, %v1455_v57, %v1338_v19  ;;  %v1537_v44 = vrot.slane %v2126_v13, 1  ;;  %v1418_v53 = vrot.slane %v2117_v47, 1 }
 0x2d2   : > { %v1581_v14 = vrot.slane %v2126_v13, 2  ;;  %v1299_v52 = vrot.slane %v1240_v50, 1  ;;  %v1539_v59 = vrot.slane %v3091_v32, 1  ;;  %v1462_v0 = vrot.slane %v2117_v47, 2 }
 0x2d3   : > { %v1580_v43 = vsel %vm428_vm0, %v1578_v22, %v1579_v40  ;;  %v1343_v2 = vrot.slane %v1240_v50, 2  ;;  %v1584_v9 = vrot.slane %v3094_v33, 2  ;;  %v1304_v11 = vrot.slane %v1243_v1, 1 }
 0x2d4   : > { %1390 = vrot.lane.b32.xlu1 %v3091_v32, %s2433_s8  ;;  %1392 = vrot.lane.b32.xlu0 %v3094_v33, %s2433_s8  ;;  %v1582_v51 = vsel %vm428_vm0, %v1579_v40, %v1581_v14  ;;  %v1463_v3 = vsel %vm428_vm0, %v1579_v40, %v1462_v0  ;;  %v1348_v26 = vrot.slane %v1243_v1, 2 }
 0x2d5   : > { %v1344_v57 = vsel %vm428_vm0, %v1579_v40, %v1343_v2 }
 0x2d8   : > { %1514 = vrot.lane.b32.xlu1 %v2130_v31, %s2438_s13  ;;  %1516 = vrot.lane.b32.xlu0 %v2131_v29, %s2438_s13 }
 0x2dc   : > { %1394 = vrot.lane.b32.xlu1 %v2130_v31, %s2433_s8  ;;  %1396 = vrot.lane.b32.xlu0 %v2131_v29, %s2433_s8  ;;  %v1534_v31 = vrot.slane %v3075_v48, 1  ;;  %v1535_v29 = vrot.slane %v3078_v7, 1 }
 0x2de   : > { %v1536_v41 = vsel %vm361_vm1, %v1534_v31, %v1535_v29  ;;  %v1538_v35 = vsel %vm361_vm1, %v1535_v29, %v1537_v44  ;;  %v1419_v62 = vsel %vm361_vm1, %v1535_v29, %v1418_v53 }
 0x2e0   : > { %1520 = vrot.lane.b32.xlu1 %v2134_v27, %s2438_s13  ;;  %1518 = vrot.lane.b32.xlu0 %v2133_v36, %s2438_s13  ;;  %v1688_v27 = vld [vmem:[%s3483_s3 + $0x10] sm:$0xff]  ;;  %v1689_v36 = vld [vmem:[%s3483_s3 + $0x18] sm:$0xff] }
 0x2e1   : > { %v2258_v37 = vpack.c.bf16 %v1689_v36, %v1688_v27  ;;  %v1349_v27 = vsel %vm428_vm0, %v1584_v9, %v1348_v26 }
 0x2e3   : > { %2259 = vmatprep.subr.bf16.mxu1 %v2258_v37 }
 0x2e4   : > { %1308 = vrot.lane.b32.xlu1 %v1290_v20, %s2435_s10  ;;  %1306 = vrot.lane.b32.xlu0 %v1288_v63, %s2435_s10  ;;  %v1540_v20 = vrot.slane %v3094_v33, 1  ;;  %v1300_v63 = vsel %vm361_vm1, %v1535_v29, %v1299_v52 }
 0x2e5   : > { %2261 = vmatpush3.bf16.msra.mxu1 %v2258_v37 }
 0x2e6   : > { %2232 = vmatprep.subr.msk.mxu1 %vm890_vm2, %v1690_v34  ;;  %v1541_v60 = vsel %vm361_vm1, %v1539_v59, %v1540_v20  ;;  %v1305_v31 = vsel %vm361_vm1, %v1540_v20, %v1304_v11 }
 0x2e8   : > { %1352 = vrot.lane.b32.xlu1 %v1334_v15, %s2434_s9  ;;  %1350 = vrot.lane.b32.xlu0 %v1332_v16, %s2434_s9  ;;  %v2129_v15 = vld [vmem:[%s3062_s30 + $0x58] sm:$0x3]  ;;  %v1583_v16 = vrot.slane %v3091_v32, 2 }
 0x2e9   : > { %2233 = vmatpush3.msk.msra.mxu1 %vm890_vm2, %v1690_v34  ;;  %v1542_v46 = vrot.slane %v2129_v15, 1  ;;  %v1586_v21 = vrot.slane %v2129_v15, 2 }
 0x2ea   : > { %v1585_v18 = vsel %vm428_vm0, %v1583_v16, %v1584_v9 }
 0x2eb   : > { %v1543_v5 = vsel %vm361_vm1, %v1540_v20, %v1542_v46  ;;  %v1587_v23 = vsel %vm428_vm0, %v1584_v9, %v1586_v21 }
 0x2ec   : > { %1310 = vrot.lane.b32.xlu1 %v1293_v6, %s2435_s10  ;;  %1430 = vrot.lane.b32.xlu0 %v1293_v6, %s2436_s11  ;;  %v2120_v6 = vld [vmem:[%s3062_s30 + $0x58] sm:$0x3] }
 0x2ed   : > { %v1467_v29 = vrot.slane %v2120_v6, 2 }
 0x2f0   : > { %1474 = vrot.lane.b32.xlu1 %v1456_v17, %s2437_s12  ;;  %1432 = vrot.lane.b32.xlu0 %v1414_v8, %s2436_s11 }
 0x2f4   : > { %1354 = vrot.lane.b32.xlu1 %v1456_v17, %s2434_s9  ;;  %1312 = vrot.lane.b32.xlu0 %v1295_v25, %s2435_s10  ;;  %v1423_v17 = vrot.slane %v2120_v6, 1  ;;  %v1468_v25 = vsel %vm428_vm0, %v1584_v9, %v1467_v29 }
 0x2f6   : > { %v1424_v8 = vsel %vm361_vm1, %v1540_v20, %v1423_v17 }
 0x2f8   : > { %1554 = vrot.lane.b32.xlu1 %v1536_v41, %s2439_s29  ;;  %1476 = vrot.lane.b32.xlu0 %v1458_v28, %s2437_s12 }
 0x2fc   : > { %1434 = vrot.lane.b32.xlu1 %v1536_v41, %s2436_s11  ;;  %1356 = vrot.lane.b32.xlu0 %v1339_v24, %s2434_s9 }
 0x300   : > { %1598 = vrot.lane.b32.xlu1 %v1580_v43, %s2440_s14  ;;  %1556 = vrot.lane.b32.xlu0 %v1538_v35, %s2439_s29 }
 0x304   : > { %1436 = vrot.lane.b32.xlu1 %v1419_v62, %s2436_s11  ;;  %1314 = vrot.lane.b32.xlu0 %v1536_v41, %s2435_s10 }
 0x308   : > { %1600 = vrot.lane.b32.xlu1 %v1582_v51, %s2440_s14  ;;  %1478 = vrot.lane.b32.xlu0 %v1580_v43, %s2437_s12 }
 0x30c   : > { %1358 = vrot.lane.b32.xlu1 %v1580_v43, %s2434_s9  ;;  %1316 = vrot.lane.b32.xlu0 %v1300_v63, %s2435_s10 }
 0x310   : > { %1558 = vrot.lane.b32.xlu1 %v1541_v60, %s2439_s29  ;;  %1480 = vrot.lane.b32.xlu0 %v1463_v3, %s2437_s12 }
 0x314   : > { %1438 = vrot.lane.b32.xlu1 %v1541_v60, %s2436_s11  ;;  %1360 = vrot.lane.b32.xlu0 %v1344_v57, %s2434_s9 }
 0x318   : > { %1602 = vrot.lane.b32.xlu1 %v1585_v18, %s2440_s14  ;;  %1560 = vrot.lane.b32.xlu0 %v1543_v5, %s2439_s29 }
 0x31c   : > { %1440 = vrot.lane.b32.xlu1 %v1424_v8, %s2436_s11  ;;  %1318 = vrot.lane.b32.xlu0 %v1541_v60, %s2435_s10 }
 0x320   : > { %1604 = vrot.lane.b32.xlu1 %v1587_v23, %s2440_s14  ;;  %1482 = vrot.lane.b32.xlu0 %v1585_v18, %s2437_s12 }
 0x324   : > { %1362 = vrot.lane.b32.xlu1 %v1585_v18, %s2434_s9  ;;  %1320 = vrot.lane.b32.xlu0 %v1305_v31, %s2435_s10 }
 0x328   : > { %1562 = vrot.lane.b32.xlu1 %v3105_v39, %s2439_s29  ;;  %1484 = vrot.lane.b32.xlu0 %v1468_v25, %s2437_s12 }
 0x32c   : > { %1442 = vrot.lane.b32.xlu1 %v3105_v39, %s2436_s11  ;;  %1364 = vrot.lane.b32.xlu0 %v1349_v27, %s2434_s9 }
 0x330   : > { %1606 = vrot.lane.b32.xlu1 %v3113_v42, %s2440_s14  ;;  %1564 = vrot.lane.b32.xlu0 %v3116_v49, %s2439_s29 }
 0x334   : > { %1486 = vrot.lane.b32.xlu1 %v3113_v42, %s2437_s12  ;;  %1444 = vrot.lane.b32.xlu0 %v3119_v54, %s2436_s11  ;;  %s2076_s11 = sshll.u32 %s3501_s25, 1 }
 0x336   : > { %v1385_v36 = vpop.permute.xlu1 %1384  ;;  %v1383_v37 = vpop.permute.xlu0 %1382 }
 0x338   : > { %1488 = vrot.lane.b32.xlu1 %v3127_v38, %s2437_s12  ;;  %1608 = vrot.lane.b32.xlu0 %v3130_v55, %s2440_s14  ;;  %s2077_s12 = sshll.u32 %s3497_s19, 5 }
 0x33a   : > { %v1507_v39 = vpop.permute.xlu1 %1506  ;;  %v1509_v41 = vpop.permute.xlu0 %1508 }
 0x33c   : > { %1568 = vrot.lane.b32.xlu1 %v3133_v58, %s2439_s29  ;;  %1566 = vrot.lane.b32.xlu0 %v3122_v12, %s2439_s29  ;;  %s260_s29 = sadd.s32 %s2077_s12, %s2076_s11 }
 0x33d   : > { %s2078_s30 = sshll.u32 %s260_s29, 3 }
 0x33e   : > { %v1387_v42 = vpop.permute.xlu1 %1386  ;;  %v1389_v49 = vpop.permute.xlu0 %1388 }
 0x340   : > { %1612 = vrot.lane.b32.xlu1 %v3136_v56, %s2440_s14  ;;  %1610 = vrot.lane.b32.xlu0 %v3139_v30, %s2440_s14  ;;  %s3426_s14 = scalar_lea.vmem %s2512_s7, %s3059_s28  ;;  %s3435_s7 = scalar_lea.vmem %s3485_s5, %s2078_s30 }
 0x342   : > { %v1511_v54 = vpop.permute.xlu1 %1510  ;;  %v3279_v38 = vpop.permute.xlu0 %1512 }
 0x346   : > { %v3281_v55 = vpop.permute.xlu1 %1390  ;;  %v3283_v28 = vpop.permute.xlu0 %1392 }
 0x34a   : > { %v3285_v19 = vpop.permute.xlu1 %1514  ;;  %v3287_v58 = vpop.permute.xlu0 %1516 }
 0x34e   : > { %v3289_v12 = vpop.permute.xlu1 %1394  ;;  %v3291_v34 = vpop.permute.xlu0 %1396 }
 0x352   : > { %v3293_v13 = vpop.permute.xlu1 %1520  ;;  %v3295_v56 = vpop.permute.xlu0 %1518 }
 0x356   : > { %v1309_v30 = vpop.permute.xlu1 %1308  ;;  %v1307_v22 = vpop.permute.xlu0 %1306 }
 0x357   : > { %v1622_v14 = vsel %vm737_vm3, %v3148_v45, %v1307_v22  ;;  %v1623_v3 = vsel %vm737_vm3, %v3142_v61, %v1309_v30 }
 0x35a   : > { %v1353_v40 = vpop.permute.xlu1 %1352  ;;  %v1351_v24 = vpop.permute.xlu0 %1350 }
 0x35b   : > { %v1630_v50 = vsel %vm750_vm4, %v1622_v14, %v1351_v24  ;;  %v1631_v2 = vsel %vm750_vm4, %v1623_v3, %v1353_v40 }
 0x35c   : > { %v1638_v59 = vsel %vm763_vm5, %v1630_v50, %v1383_v37  ;;  %v1639_v46 = vsel %vm763_vm5, %v1631_v2, %v1385_v36 }
 0x35e   : > { %v1311_v44 = vpop.permute.xlu1 %1310  ;;  %v1431_v47 = vpop.permute.xlu0 %1430 }
 0x35f   : > { %v1646_v20 = vsel %vm776_vm6, %v1638_v59, %v1431_v47  ;;  %v1624_v6 = vsel %vm737_vm3, %v3068_v10, %v1311_v44 }
 0x362   : > { %v1475_v43 = vpop.permute.xlu1 %1474  ;;  %v1433_v35 = vpop.permute.xlu0 %1432 }
 0x363   : > { %v1654_v63 = vsel %vm789_vm7, %v1646_v20, %v1475_v43  ;;  %v1647_v18 = vsel %vm776_vm6, %v1639_v46, %v1433_v35 }
 0x364   : > { %v1662_v15 = vsel %vm802_vm8, %v1654_v63, %v1507_v39 }
 0x366   : > { %v1355_v53 = vpop.permute.xlu1 %1354  ;;  %v1313_v62 = vpop.permute.xlu0 %1312 }
 0x367   : > { %v1632_v61 = vsel %vm750_vm4, %v1624_v6, %v1355_v53  ;;  %v1625_v27 = vsel %vm737_vm3, %v3065_v4, %v1313_v62 }
 0x368   : > { %v1640_v21 = vsel %vm763_vm5, %v1632_v61, %v1387_v42 }
 0x36a   : > { %v1555_v51 = vpop.permute.xlu1 %1554  ;;  %v1477_v52 = vpop.permute.xlu0 %1476 }
 0x36b   : > { %v1670_v45 = vsel %vm815_vm9, %v1662_v15, %v1555_v51  ;;  %v1655_v5 = vsel %vm789_vm7, %v1647_v18, %v1477_v52 }
 0x36c   : > { %v1663_v1 = vsel %vm802_vm8, %v1655_v5, %v1509_v41 }
 0x36e   : > { %v1435_v0 = vpop.permute.xlu1 %1434  ;;  %v1357_v60 = vpop.permute.xlu0 %1356 }
 0x36f   : > { %v1648_v23 = vsel %vm776_vm6, %v1640_v21, %v1435_v0  ;;  %v1633_v36 = vsel %vm750_vm4, %v1625_v27, %v1357_v60 }
 0x370   : > { %v1641_v41 = vsel %vm763_vm5, %v1633_v36, %v1389_v49 }
 0x372   : > { %v1599_v16 = vpop.permute.xlu1 %1598  ;;  %v1557_v9 = vpop.permute.xlu0 %1556 }
 0x373   : > { %v1678_v57 = vsel %vm828_vm10, %v1670_v45, %v1599_v16  ;;  %v1671_v11 = vsel %vm815_vm9, %v1663_v1, %v1557_v9 }
 0x374   : > { %2234 = vmatprep.mubr.msk.f32.mxu1 %vm853_vm11, %v1678_v57 }
 0x376   : > { %v1437_v17 = vpop.permute.xlu1 %1436  ;;  %v1315_v8 = vpop.permute.xlu0 %1314 }
 0x377   : > { %v1649_v42 = vsel %vm776_vm6, %v1641_v41, %v1437_v17  ;;  %v1626_v59 = vsel %vm737_vm3, %v3075_v48, %v1315_v8 }
 0x37a   : > { %v1601_v31 = vpop.permute.xlu1 %1600  ;;  %v1479_v29 = vpop.permute.xlu0 %1478 }
 0x37b   : > { %v1679_v10 = vsel %vm828_vm10, %v1671_v11, %v1601_v31  ;;  %v1656_v25 = vsel %vm789_vm7, %v1648_v23, %v1479_v29 }
 0x37c   : > { %2235 = vmatmul.mubr.msk.f32.vlgmr.msra.gmra.mrb[0].mxu1 %vm853_vm11, %v1679_v10  ;;  %v1664_v26 = vsel %vm802_vm8, %v1656_v25, %v1511_v54 }
 0x37e   : > { %v1359_v37 = vpop.permute.xlu1 %1358  ;;  %v1317_v39 = vpop.permute.xlu0 %1316 }
 0x37f   : > { %v1634_v20 = vsel %vm750_vm4, %v1626_v59, %v1359_v37  ;;  %v1627_v16 = vsel %vm737_vm3, %v3078_v7, %v1317_v39 }
 0x380   : > { %v1642_v60 = vsel %vm763_vm5, %v1634_v20, %v3281_v55 }
 0x382   : > { %v1559_v30 = vpop.permute.xlu1 %1558  ;;  %v1481_v22 = vpop.permute.xlu0 %1480 }
 0x383   : > { %v1657_v40 = vsel %vm789_vm7, %v1649_v42, %v1481_v22  ;;  %v1672_v47 = vsel %vm815_vm9, %v1664_v26, %v1559_v30 }
 0x384   : > { %v1665_v24 = vsel %vm802_vm8, %v1657_v40, %v3279_v38 }
 0x386   : > { %v1439_v44 = vpop.permute.xlu1 %1438  ;;  %v1361_v54 = vpop.permute.xlu0 %1360 }
 0x387   : > { %v1650_v3 = vsel %vm776_vm6, %v1642_v60, %v1439_v44  ;;  %v1635_v9 = vsel %vm750_vm4, %v1627_v16, %v1361_v54 }
 0x388   : > { %v1643_v18 = vsel %vm763_vm5, %v1635_v9, %v3283_v28 }
 0x38a   : > { %v1603_v4 = vpop.permute.xlu1 %1602  ;;  %v1561_v43 = vpop.permute.xlu0 %1560 }
 0x38b   : > { %v1680_v35 = vsel %vm828_vm10, %v1672_v47, %v1603_v4  ;;  %v1673_v62 = vsel %vm815_vm9, %v1665_v24, %v1561_v43 }
 0x38c   : > { %2237 = vmatprep.mubr.msk.f32.mxu1 %vm853_vm11, %v1680_v35 }
 0x38e   : > { %v1441_v49 = vpop.permute.xlu1 %1440  ;;  %v1319_v53 = vpop.permute.xlu0 %1318 }
 0x38f   : > { %v1651_v61 = vsel %vm776_vm6, %v1643_v18, %v1441_v49 }
 0x392   : > { %v1605_v14 = vpop.permute.xlu1 %1604  ;;  %v1483_v50 = vpop.permute.xlu0 %1482 }
 0x393   : > { %v1681_v51 = vsel %vm828_vm10, %v1673_v62, %v1605_v14  ;;  %v1658_v2 = vsel %vm789_vm7, %v1650_v3, %v1483_v50 }
 0x394   : > { %2238 = vmatmul.mubr.msk.f32.gmra.mrb[2].mxu1 %vm853_vm11, %v1681_v51  ;;  %v1666_v48 = vsel %vm802_vm8, %v1658_v2, %v3285_v19  ;;  %v1628_v19 = vsel %vm737_vm3, %v3091_v32, %v1319_v53 }
 0x396   : > { %v1363_v38 = vpop.permute.xlu1 %1362  ;;  %v1321_v52 = vpop.permute.xlu0 %1320 }
 0x397   : > { %v1629_v8 = vsel %vm737_vm3, %v3094_v33, %v1321_v52  ;;  %v1636_v21 = vsel %vm750_vm4, %v1628_v19, %v1363_v38 }
 0x398   : > { %v1644_v10 = vsel %vm763_vm5, %v1636_v21, %v3289_v12 }
 0x39a   : > { %v1563_v63 = vpop.permute.xlu1 %1562  ;;  %v1485_v0 = vpop.permute.xlu0 %1484 }
 0x39b   : > { %v1674_v57 = vsel %vm815_vm9, %v1666_v48, %v1563_v63  ;;  %v1659_v7 = vsel %vm789_vm7, %v1651_v61, %v1485_v0 }
 0x39c   : > { %v1667_v28 = vsel %vm802_vm8, %v1659_v7, %v3287_v58 }
 0x39e   : > { %v1443_v15 = vpop.permute.xlu1 %1442  ;;  %v1365_v45 = vpop.permute.xlu0 %1364 }
 0x39f   : > { %v1637_v1 = vsel %vm750_vm4, %v1629_v8, %v1365_v45  ;;  %v1652_v33 = vsel %vm776_vm6, %v1644_v10, %v1443_v15 }
 0x3a0   : > { %v1645_v32 = vsel %vm763_vm5, %v1637_v1, %v3291_v34 }
 0x3a2   : > { %v1607_v46 = vpop.permute.xlu1 %1606  ;;  %v1565_v6 = vpop.permute.xlu0 %1564 }
 0x3a3   : > { %v1682_v55 = vsel %vm828_vm10, %v1674_v57, %v1607_v46  ;;  %v1675_v23 = vsel %vm815_vm9, %v1667_v28, %v1565_v6 }
 0x3a4   : > { %2240 = vmatprep.mubr.msk.f32.mxu1 %vm853_vm11, %v1682_v55 }
 0x3a6   : > { %v1487_v5 = vpop.permute.xlu1 %1486  ;;  %v1445_v17 = vpop.permute.xlu0 %1444 }
 0x3a7   : > { %v1653_v25 = vsel %vm776_vm6, %v1645_v32, %v1445_v17  ;;  %v1660_v58 = vsel %vm789_vm7, %v1652_v33, %v1487_v5 }
 0x3a8   : > { %v1668_v12 = vsel %vm802_vm8, %v1660_v58, %v3295_v56 }
 0x3aa   : > { %v1489_v11 = vpop.permute.xlu1 %1488  ;;  %v1609_v31 = vpop.permute.xlu0 %1608 }
 0x3ab   : > { %v1683_v29 = vsel %vm828_vm10, %v1675_v23, %v1609_v31  ;;  %v1661_v26 = vsel %vm789_vm7, %v1653_v25, %v1489_v11 }
 0x3ac   : > { %2241 = vmatmul.mubr.msk.f32.gmra.mrb[4].mxu1 %vm853_vm11, %v1683_v29  ;;  %v1669_v37 = vsel %vm802_vm8, %v1661_v26, %v3293_v13  ;;  %v2136_v13 = vld [vmem:[%s3484_s4] ss:$0 sm:$0xff] }
 0x3ae   : > { %v1569_v27 = vpop.permute.xlu1 %1568  ;;  %v1567_v36 = vpop.permute.xlu0 %1566 }
 0x3af   : > { %v1677_v34 = vsel %vm815_vm9, %v1669_v37, %v1569_v27  ;;  %v1676_v39 = vsel %vm815_vm9, %v1668_v12, %v1567_v36  ;;  %v2155_v27 = vld [vmem:[%s3426_s14 + $0x21] sm:$0xff]  ;;  %v2154_v12 = vld [vmem:[%s3426_s14 + $0x19] sm:$0xff] }
 0x3b2   : > { %v1613_v41 = vpop.permute.xlu1 %1612  ;;  %v1611_v42 = vpop.permute.xlu0 %1610 }
 0x3b3   : > { %v1685_v30 = vsel %vm828_vm10, %v1677_v34, %v1613_v41  ;;  %v1684_v22 = vsel %vm828_vm10, %v1676_v39, %v1611_v42 }
 0x3b4   : > { %2243 = vmatprep.mubr.msk.f32.mxu1 %vm853_vm11, %v1684_v22 }
 0x3b5   : > { %2244 = vmatmul.mubr.msk.f32.gmra.mrb[6].mxu1 %vm853_vm11, %v1685_v30 }
 0x44f   : > { %v2236_v40 = vpop.f32.mrb[0].mxu1 }
 0x450   : > { %v3389_v56 = vadd.f32 %v2236_v40, %v2136_v13  ;;  %v1791_v24 = vpop.f32.mrb[1].mxu1 }
 0x451   : > { %v3391_v44 = vadd.f32 %v2136_v13, %v1791_v24 }
 0x452   : > { %v2147_v54 = vmul.f32 -1.442695, %v3389_v56 }
 0x453   : > { %v2146_v47 = vmul.f32 -1.442695, %v3391_v44 }
 0x454   : > { %2361 = vpow2.f32 %v2147_v54  ;;  %v2156_v54 = vld [vmem:[%s3426_s14 + $0x31] sm:$0xff] }
 0x455   : > { %2363 = vpow2.f32 %v2146_v47 }
 0x45e   : > { %v2362_v4 = vpop.eup %2361 }
 0x45f   : > { %v2364_v43 = vpop.eup %2363  ;;  %v1855_v35 = vadd.f32 1.0, %v2362_v4 }
 0x460   : > { %v1854_v49 = vadd.f32 1.0, %v2364_v43 }
 0x461   : > { %2365 = vrcp.f32 %v1855_v35 }
 0x462   : > { %2367 = vrcp.f32 %v1854_v49 }
 0x467   : > { %v2239_v53 = vpop.f32.mrb[2].mxu1 }
 0x468   : > { %v3395_v62 = vadd.f32 %v2239_v53, %v2136_v13  ;;  %v1801_v14 = vpop.f32.mrb[3].mxu1 }
 0x469   : > { %v3397_v50 = vadd.f32 %v2136_v13, %v1801_v14 }
 0x46a   : > { %v2149_v51 = vmul.f32 -1.442695, %v3395_v62 }
 0x46b   : > { %v2366_v38 = vpop.eup %2365  ;;  %v2148_v52 = vmul.f32 -1.442695, %v3397_v50 }
 0x46c   : > { %v2368_v59 = vpop.eup %2367  ;;  %2369 = vpow2.f32 %v2149_v51  ;;  %1888 = vrot.lane.b32.xlu1 %v2366_v38, %s2441_s17 }
 0x46d   : > { %2371 = vpow2.f32 %v2148_v52  ;;  %1886 = vrot.lane.b32.xlu0 %v2368_v59, %s2441_s17  ;;  %v2158_v52 = vld [vmem:[%s3426_s14 + $0x49] sm:$0xff] }
 0x476   : > { %v2370_v20 = vpop.eup %2369 }
 0x477   : > { %v2372_v63 = vpop.eup %2371  ;;  %v1857_v0 = vadd.f32 1.0, %v2370_v20 }
 0x478   : > { %v1856_v60 = vadd.f32 1.0, %v2372_v63 }
 0x479   : > { %2373 = vrcp.f32 %v1857_v0 }
 0x47a   : > { %2375 = vrcp.f32 %v1856_v60 }
 0x47f   : > { %v2242_v3 = vpop.f32.mrb[4].mxu1 }
 0x480   : > { %v3403_v2 = vadd.f32 %v2242_v3, %v2136_v13  ;;  %v1811_v15 = vpop.f32.mrb[5].mxu1 }
 0x481   : > { %v3405_v45 = vadd.f32 %v2136_v13, %v1811_v15 }
 0x482   : > { %v2151_v16 = vmul.f32 -1.442695, %v3403_v2 }
 0x483   : > { %v2374_v9 = vpop.eup %2373  ;;  %v2150_v48 = vmul.f32 -1.442695, %v3405_v45 }
 0x484   : > { %v2376_v57 = vpop.eup %2375  ;;  %2377 = vpow2.f32 %v2151_v16  ;;  %1892 = vrot.lane.b32.xlu1 %v2374_v9, %s2441_s17 }
 0x485   : > { %2379 = vpow2.f32 %v2150_v48  ;;  %1890 = vrot.lane.b32.xlu0 %v2376_v57, %s2441_s17  ;;  %v2160_v48 = vld [vmem:[%s3426_s14 + $0x61] sm:$0xff] }
 0x488   : > { %v2245_v46 = vpop.f32.mrb[6].mxu1 }
 0x489   : > { %v3411_v6 = vadd.f32 %v2245_v46, %v2136_v13  ;;  %v1821_v55 = vpop.f32.mrb[7].mxu1 }
 0x48a   : > { %v3413_v18 = vadd.f32 %v2136_v13, %v1821_v55 }
 0x48b   : > { %v2153_v61 = vmul.f32 -1.442695, %v3411_v6 }
 0x48c   : > { %v2152_v7 = vmul.f32 -1.442695, %v3413_v18 }
 0x48d   : > { %2381 = vpow2.f32 %v2153_v61 }
 0x48e   : > { %v2378_v5 = vpop.eup %2377  ;;  %2383 = vpow2.f32 %v2152_v7 }
 0x48f   : > { %v2380_v17 = vpop.eup %2379  ;;  %v1859_v19 = vadd.f32 1.0, %v2378_v5 }
 0x490   : > { %v1858_v8 = vadd.f32 1.0, %v2380_v17 }
 0x491   : > { %2385 = vrcp.f32 %v1859_v19 }
 0x492   : > { %2387 = vrcp.f32 %v1858_v8 }
 0x497   : > { %v2382_v21 = vpop.eup %2381 }
 0x498   : > { %v2384_v1 = vpop.eup %2383  ;;  %v1861_v28 = vadd.f32 1.0, %v2382_v21 }
 0x499   : > { %v1860_v23 = vadd.f32 1.0, %v2384_v1 }
 0x49a   : > { %2389 = vrcp.f32 %v1861_v28 }
 0x49b   : > { %v2386_v11 = vpop.eup %2385  ;;  %2391 = vrcp.f32 %v1860_v23 }
 0x49c   : > { %v2388_v31 = vpop.eup %2387  ;;  %1896 = vrot.lane.b32.xlu1 %v2386_v11, %s2441_s17 }
 0x49d   : > { %1894 = vrot.lane.b32.xlu0 %v2388_v31, %s2441_s17 }
 0x4a4   : > { %v2390_v29 = vpop.eup %2389 }
 0x4a5   : > { %v2392_v10 = vpop.eup %2391  ;;  %1900 = vrot.lane.b32.xlu1 %v2390_v29, %s2441_s17 }
 0x4a6   : > { %1898 = vrot.lane.b32.xlu0 %v2392_v10, %s2441_s17 }
 0x4de   : > { %v1889_v32 = vpop.permute.xlu1 %1888 }
 0x4df   : > { %v1911_v33 = vmul.f32 %v1889_v32, %v3389_v56  ;;  %v1887_v25 = vpop.permute.xlu0 %1886  ;;  %v2157_v56 = vld [vmem:[%s3426_s14 + $0x39] sm:$0xff] }
 0x4e0   : > { %v1910_v58 = vmul.f32 %v1887_v25, %v3391_v44 }
 0x4e1   : > { %v1919_v26 = vmul.f32 1.8, %v1911_v33 }
 0x4e2   : > { %v1918_v36 = vmul.f32 1.8, %v1910_v58 }
 0x4e3   : > { %v1936_v37 = vmul.f32 0.2, %v1919_v26 }
 0x4e4   : > { %v1935_v34 = vmul.f32 0.2, %v1918_v36 }
 0x4e5   : > { %v1944_v39 = vadd.f32 %v2155_v27, %v1936_v37 }
 0x4e6   : > { %v1943_v41 = vadd.f32 %v2154_v12, %v1935_v34 }
 0x4e7   : > { %1952 = vst.msk [vmem:[%s3435_s7 + $0x8] sm:$0xff] %vm737_vm3, %v1944_v39 }
 0x4e8   : > { %1951 = vst.msk [vmem:[%s3435_s7] sm:$0xff] %vm737_vm3, %v1943_v41 }
 0x4f6   : > { %v1893_v42 = vpop.permute.xlu1 %1892 }
 0x4f7   : > { %v1913_v30 = vmul.f32 %v1893_v42, %v3395_v62  ;;  %v1891_v22 = vpop.permute.xlu0 %1890 }
 0x4f8   : > { %v1912_v13 = vmul.f32 %v1891_v22, %v3397_v50  ;;  %v2159_v50 = vld [vmem:[%s3426_s14 + $0x51] sm:$0xff] }
 0x4f9   : > { %v1921_v40 = vmul.f32 1.8, %v1913_v30 }
 0x4fa   : > { %v1920_v24 = vmul.f32 1.8, %v1912_v13 }
 0x4fb   : > { %v1938_v44 = vmul.f32 0.2, %v1921_v40 }
 0x4fc   : > { %v1937_v47 = vmul.f32 0.2, %v1920_v24 }
 0x4fd   : > { %v1946_v4 = vadd.f32 %v2157_v56, %v1938_v44 }
 0x4fe   : > { %v1945_v43 = vadd.f32 %v2156_v54, %v1937_v47 }
 0x4ff   : > { %1954 = vst.msk [vmem:[%s3435_s7 + $0x18] sm:$0xff] %vm737_vm3, %v1946_v4 }
 0x500   : > { %1953 = vst.msk [vmem:[%s3435_s7 + $0x10] sm:$0xff] %vm737_vm3, %v1945_v43 }
 0x50e   : > { %v1897_v35 = vpop.permute.xlu1 %1896 }
 0x50f   : > { %v1915_v49 = vmul.f32 %v1897_v35, %v3403_v2  ;;  %v1895_v53 = vpop.permute.xlu0 %1894 }
 0x510   : > { %v1914_v62 = vmul.f32 %v1895_v53, %v3405_v45  ;;  %v2161_v45 = vld [vmem:[%s3426_s14 + $0x69] sm:$0xff] }
 0x511   : > { %v1923_v14 = vmul.f32 1.8, %v1915_v49 }
 0x512   : > { %v1922_v51 = vmul.f32 1.8, %v1914_v62 }
 0x513   : > { %v1940_v38 = vmul.f32 0.2, %v1923_v14 }
 0x514   : > { %v1939_v59 = vmul.f32 0.2, %v1922_v51 }
 0x515   : > { %v1948_v20 = vadd.f32 %v2159_v50, %v1940_v38 }
 0x516   : > { %v1947_v63 = vadd.f32 %v2158_v52, %v1939_v59 }
 0x517   : > { %1956 = vst.msk [vmem:[%s3435_s7 + $0x28] sm:$0xff] %vm737_vm3, %v1948_v20  ;;  %v1901_v0 = vpop.permute.xlu1 %1900 }
 0x518   : > { %1955 = vst.msk [vmem:[%s3435_s7 + $0x20] sm:$0xff] %vm737_vm3, %v1947_v63  ;;  %v1917_v60 = vmul.f32 %v1901_v0, %v3411_v6  ;;  %v1899_v3 = vpop.permute.xlu0 %1898 }
 0x519   : > { %v1916_v2 = vmul.f32 %v1899_v3, %v3413_v18 }
 0x51a   : > { %v1925_v15 = vmul.f32 1.8, %v1917_v60 }
 0x51b   : > { %v1924_v16 = vmul.f32 1.8, %v1916_v2 }
 0x51c   : > { %v1942_v9 = vmul.f32 0.2, %v1925_v15 }
 0x51d   : > { %v1941_v57 = vmul.f32 0.2, %v1924_v16 }
 0x51e   : > { %v1950_v46 = vadd.f32 %v2161_v45, %v1942_v9 }
 0x51f   : > { %v1949_v55 = vadd.f32 %v2160_v48, %v1941_v57 }
 0x520   : > { %1958 = vst.msk [vmem:[%s3435_s7 + $0x38] sm:$0xff] %vm737_vm3, %v1950_v46 }
 0x521   : > { %1957 = vst.msk [vmem:[%s3435_s7 + $0x30] sm:$0xff] %vm737_vm3, %v1949_v55 }
 0x522 PF: > { %s15_s22 = sadd.s32 1, %s2431_s22   ;;  %s3486_s18 = smov %s2423_s20 }
 0x523   : > { %p12_p10 = scmp.ge.s32.totalorder %s15_s22, 10   ;;  %s3487_s19 = smov %s2427_s21 }
 0x524   : > { %s3488_s20 = smov %s3491_s23  ;;  %s3489_s21 = smov %s3495_s24 }
 0x525   :  { %14 = sbr.rel (!%p12_p10) target bundleno = 3 (0x3), region = 78 }

</bundles_post_ra>
